<compile_context>
chip_gen: v7x
topology: tpu7x:2x2x1
jax: 0.10.0
libtpu: 0.0.40
codegen_flags: <defaults>
</compile_context>

<pallas_src>
import functools

import jax
import jax.numpy as jnp
from jax import lax
from jax.experimental import pallas as pl
from jax.experimental.pallas import tpu as pltpu


# ---------------------------------------------------------------------------
# hardware-aware tiling helpers
# ---------------------------------------------------------------------------

def _hw_caps():
    """Tile caps + scoped-VMEM limit per TPU generation (conservative on v7x)."""
    try:
        cap = int(getattr(pltpu.get_tpu_info(), "vmem_capacity_bytes", 64 << 20))
    except Exception:  # pragma: no cover - defensive (e.g. interpret mode)
        cap = 64 << 20
    if cap >= (96 << 20):            # v5e / v6e: 128 MiB physical VMEM
        return dict(tm_max=512, tn_max=1024, vmem_limit=64 << 20)
    else:                            # v7x: 64 MiB physical VMEM
        return dict(tm_max=512, tn_max=512, vmem_limit=40 << 20)


_CAPS = _hw_caps()


def _pick_tile(dim, max_tile, align):
    """Largest tile <= max_tile that is `align`-aligned; full dim if it fits."""
    if dim <= max_tile:
        return dim                      # full-extent block is always legal
    t = max_tile
    while t >= align:
        if dim % t == 0:
            return t
        t -= align
    return max_tile                     # rely on cdiv grid + boundary padding


# ---------------------------------------------------------------------------
# fused (LayerNorm?) -> matmul -> +bias -> (gelu?) -> (+residual?) kernel
#   grid = (M_tiles, N_tiles), N innermost; LN(x) is computed once per M-tile
#   (at j == 0) into a bf16 VMEM scratch and reused across N-tiles.
# ---------------------------------------------------------------------------

def _fused_linear_kernel(*refs, has_ln, act, has_res, eps):
    it = iter(refs)
    x_ref = next(it)
    g_ref = next(it) if has_ln else None
    b_ref = next(it) if has_ln else None
    w_ref = next(it)
    bias_ref = next(it)
    res_ref = next(it) if has_res else None
    o_ref = next(it)
    xn_ref = next(it) if has_ln else None      # VMEM scratch for LN(x) in bf16

    if has_ln:
        @pl.when(pl.program_id(1) == 0)        # compute LN once per M-tile
        def _():
            xf = x_ref[...].astype(jnp.float32)
            mu = jnp.mean(xf, axis=-1, keepdims=True)
            var = jnp.mean(jnp.square(xf - mu), axis=-1, keepdims=True)
            xf = (xf - mu) * lax.rsqrt(var + eps)
            xn_ref[...] = (xf * g_ref[...] + b_ref[...]).astype(jnp.bfloat16)
        xb = xn_ref[...]
    else:
        xb = x_ref[...].astype(jnp.bfloat16)

    # bf16 x bf16 MXU matmul, f32 accumulation.
    y = jnp.dot(xb, w_ref[...], preferred_element_type=jnp.float32)
    y = y + bias_ref[...].astype(jnp.float32)

    if act == "gelu_tanh":                     # gelu_pytorch_tanh, f32
        c = 0.7978845608028654                 # sqrt(2/pi)
        y = 0.5 * y * (1.0 + jnp.tanh(c * (y + 0.044715 * y * y * y)))

    if has_res:                                # residual-add epilogue, f32 accum
        y = y + res_ref[...].astype(jnp.float32)

    o_ref[...] = y.astype(o_ref.dtype)


def fused_linear(x, w, bias, *, gamma=None, beta=None, residual=None,
                 act=None, eps=1e-6, out_dtype=jnp.bfloat16):
    """y = [LN(x)] @ w + bias [-> gelu] [+ residual].   x:[M,K] w:[K,N] -> [M,N].

    NOTE: partial M/N tiles are zero/garbage-padded by Pallas; the LN/gelu math
    on padded rows is garbage but strictly row-local and clipped on store, so
    outputs are correct.  Do not add cross-row reductions to this kernel.
    """
    M, K = x.shape
    N = w.shape[1]
    tm = _pick_tile(M, _CAPS["tm_max"], 8)
    tn = _pick_tile(N, _CAPS["tn_max"], 128)
    grid = (pl.cdiv(M, tm), pl.cdiv(N, tn))    # M outer, N inner

    has_ln = gamma is not None
    has_res = residual is not None

    in_specs = [pl.BlockSpec((tm, K), lambda i, j: (i, 0))]
    args = [x]
    if has_ln:
        in_specs += [pl.BlockSpec((1, K), lambda i, j: (0, 0)),
                     pl.BlockSpec((1, K), lambda i, j: (0, 0))]
        args += [gamma.reshape(1, K), beta.reshape(1, K)]
    in_specs += [pl.BlockSpec((K, tn), lambda i, j: (0, j)),
                 pl.BlockSpec((1, tn), lambda i, j: (0, j))]
    args += [w, bias.reshape(1, N)]
    if has_res:
        in_specs.append(pl.BlockSpec((tm, tn), lambda i, j: (i, j)))
        args.append(residual)

    scratch_shapes = [pltpu.VMEM((tm, K), jnp.bfloat16)] if has_ln else []

    kernel = functools.partial(_fused_linear_kernel, has_ln=has_ln, act=act,
                               has_res=has_res, eps=eps)
    return pl.pallas_call(
        kernel,
        out_shape=jax.ShapeDtypeStruct((M, N), out_dtype),
        grid=grid,
        in_specs=in_specs,
        out_specs=pl.BlockSpec((tm, tn), lambda i, j: (i, j)),
        scratch_shapes=scratch_shapes,
        compiler_params=pltpu.CompilerParams(
            # N axis must stay in-order on one core (LN scratch reuse).
            dimension_semantics=("parallel", "arbitrary"),
            vmem_limit_bytes=_CAPS["vmem_limit"]),
    )(*args)


# ---------------------------------------------------------------------------
# patch embedding: per-patch matmul + bias + positional embedding, fused
# ---------------------------------------------------------------------------

def _patch_embed_kernel(x_ref, w_ref, b_ref, pos_ref, o_ref):
    x = x_ref[0].astype(jnp.bfloat16)                        # [S, K]
    y = jnp.dot(x, w_ref[...], preferred_element_type=jnp.float32)
    y = y + b_ref[...].astype(jnp.float32) + pos_ref[...].astype(jnp.float32)
    o_ref[0] = y.astype(o_ref.dtype)


def patch_embed(x3, w, bias, pos, out_dtype=jnp.bfloat16):
    """x3: [B, S, C*P*P] -> [B, S, D]  (conv-as-matmul + bias + pos add)."""
    B, S, K = x3.shape
    D = w.shape[1]
    return pl.pallas_call(
        _patch_embed_kernel,
        out_shape=jax.ShapeDtypeStruct((B, S, D), out_dtype),
        grid=(B,),
        in_specs=[pl.BlockSpec((1, S, K), lambda b: (b, 0, 0)),
                  pl.BlockSpec((K, D), lambda b: (0, 0)),
                  pl.BlockSpec((1, D), lambda b: (0, 0)),
                  pl.BlockSpec((S, D), lambda b: (0, 0))],
        out_specs=pl.BlockSpec((1, S, D), lambda b: (b, 0, 0)),
        compiler_params=pltpu.CompilerParams(dimension_semantics=("parallel",)),
    )(x3, w, bias.reshape(1, D), pos)


# ---------------------------------------------------------------------------
# standalone LayerNorm (only used for the final post_layernorm)
# ---------------------------------------------------------------------------

def _layernorm_kernel(x_ref, g_ref, b_ref, o_ref, *, eps):
    x = x_ref[...].astype(jnp.float32)
    mu = jnp.mean(x, axis=-1, keepdims=True)
    var = jnp.mean(jnp.square(x - mu), axis=-1, keepdims=True)
    y = (x - mu) * lax.rsqrt(var + eps)
    o_ref[...] = (y * g_ref[...] + b_ref[...]).astype(o_ref.dtype)


def layernorm(x, g, b, eps):
    M, D = x.shape
    tm = _pick_tile(M, _CAPS["tm_max"], 8)
    return pl.pallas_call(
        functools.partial(_layernorm_kernel, eps=eps),
        out_shape=jax.ShapeDtypeStruct((M, D), jnp.float32),
        grid=(pl.cdiv(M, tm),),
        in_specs=[pl.BlockSpec((tm, D), lambda i: (i, 0)),
                  pl.BlockSpec((1, D), lambda i: (0, 0)),
                  pl.BlockSpec((1, D), lambda i: (0, 0))],
        out_specs=pl.BlockSpec((tm, D), lambda i: (i, 0)),
        compiler_params=pltpu.CompilerParams(dimension_semantics=("parallel",)),
    )(x, g.reshape(1, D), b.reshape(1, D))


# ---------------------------------------------------------------------------
# multi-head attention: grid = (B, H), one head per grid step
#   inputs arrive head-major ([3, B, H, S, Dh]) so every load/store is a
#   dense, offset-0 [S, Dh] block (no non-128-aligned lane slicing).
# ---------------------------------------------------------------------------

def _attn_kernel(qkv_ref, o_ref, *, scale):
    q = qkv_ref[0, 0, 0]                          # [S, Dh] bf16
    k = qkv_ref[1, 0, 0]
    v = qkv_ref[2, 0, 0]
    # q @ k^T without materializing k.T (contract on head_dim of both).
    s = lax.dot_general(q, k, (((1,), (1,)), ((), ())),
                        preferred_element_type=jnp.float32) * scale
    s = s - jnp.max(s, axis=-1, keepdims=True)
    # bf16 exp: halves EUP work on v6e/v7x; lowers (via f32) on v5e.
    p = jnp.exp(s.astype(jnp.bfloat16))           # [S, S] bf16, values in [0, 1]
    denom = jnp.sum(p.astype(jnp.float32), axis=-1, keepdims=True)
    o = jnp.dot(p, v, preferred_element_type=jnp.float32)     # [S, Dh] f32
    o = o * pl.reciprocal(denom, approx=True)
    o_ref[0, 0] = o.astype(o_ref.dtype)


def attention(qkv_t, scale):
    """qkv_t: [3, B, H, S, Dh] bf16 -> attention output [B, H, S, Dh] bf16."""
    _, B, Hh, S, Dh = qkv_t.shape
    return pl.pallas_call(
        functools.partial(_attn_kernel, scale=scale),
        out_shape=jax.ShapeDtypeStruct((B, Hh, S, Dh), jnp.bfloat16),
        grid=(B, Hh),
        in_specs=[pl.BlockSpec((3, 1, 1, S, Dh), lambda b, h: (0, b, h, 0, 0))],
        out_specs=pl.BlockSpec((1, 1, S, Dh), lambda b, h: (b, h, 0, 0)),
        compiler_params=pltpu.CompilerParams(
            dimension_semantics=("parallel", "parallel")),
    )(qkv_t)


# ---------------------------------------------------------------------------
# glue / model
# ---------------------------------------------------------------------------

def _full_mask_position_ids(nb_patches_h, nb_patches_w, num_patches_per_side):
    # torch.bucketize(..., right=True) path for the all-True patch mask.
    boundaries = jnp.arange(1.0 / num_patches_per_side, 1.0, 1.0 / num_patches_per_side)
    frac_h = jnp.arange(0.0, 1.0 - 1e-6, 1.0 / nb_patches_h)
    frac_w = jnp.arange(0.0, 1.0 - 1e-6, 1.0 / nb_patches_w)
    bh = jnp.searchsorted(boundaries, frac_h, side="right")
    bw = jnp.searchsorted(boundaries, frac_w, side="right")
    return (bh[:, None] * num_patches_per_side + bw[None, :]).reshape(-1)


def idefics3_vision_transformer(pixel_values, params, cfg):
    B, C, H, W = pixel_values.shape
    P = cfg["patch_size"]
    D = cfg["hidden_size"]
    nheads = cfg["num_attention_heads"]
    Dh = D // nheads
    scale = Dh ** -0.5
    eps = cfg["layer_norm_eps"]
    nH, nW = H // P, W // P
    S = nH * nW

    # ---- embeddings: stride-P conv == per-patch matmul, + pos-emb fused ----
    x = pixel_values.reshape(B, C, nH, P, nW, P)
    x = jnp.transpose(x, (0, 2, 4, 1, 3, 5)).reshape(B, S, C * P * P)
    w_patch = jnp.transpose(params["patch_w"].reshape(D, C * P * P))   # [C*P*P, D] bf16

    pos_ids = _full_mask_position_ids(nH, nW, cfg["image_size"] // P)
    pos = jnp.take(params["pos_emb"], pos_ids, axis=0)                 # [S, D] f32

    hidden = patch_embed(x, w_patch, params["patch_b"], pos)           # [B, S, D] bf16
    hidden = hidden.reshape(B * S, D)

    # The default all-ones patch_attention_mask makes attention_mask None in
    # the reference, so no additive bias is fed to the attention kernel.
    # TODO(synk): ragged (partially-masked) images would need the per-batch
    # bucketize/scatter of position ids and a -inf additive attention mask.

    # ---- encoder layers ----
    for layer in params["layers"]:
        residual = hidden                                              # bf16
        qkv = fused_linear(hidden, layer["qkv_w"], layer["qkv_b"],
                           gamma=layer["ln1_g"], beta=layer["ln1_b"], eps=eps,
                           out_dtype=jnp.bfloat16)                     # LN1 fused
        # head-major layout for the attention kernel (one cheap transpose).
        qkv_t = jnp.transpose(qkv.reshape(B, S, 3, nheads, Dh), (2, 0, 3, 1, 4))
        attn = attention(qkv_t, scale)                                 # [B, H, S, Dh]
        attn = jnp.transpose(attn, (0, 2, 1, 3)).reshape(B * S, D)
        hidden = fused_linear(attn, layer["out_w"], layer["out_b"],
                              residual=residual,
                              out_dtype=jnp.bfloat16)                  # +res fused

        residual = hidden
        h1 = fused_linear(hidden, layer["fc1_w"], layer["fc1_b"],
                          gamma=layer["ln2_g"], beta=layer["ln2_b"], eps=eps,
                          act="gelu_tanh", out_dtype=jnp.bfloat16)     # LN2+gelu fused
        hidden = fused_linear(h1, layer["fc2_w"], layer["fc2_b"],
                              residual=residual,
                              out_dtype=jnp.bfloat16)                  # +res fused

    # ---- post layernorm ----
    hidden = layernorm(hidden, params["post_ln_g"], params["post_ln_b"], eps)
    return hidden.reshape(B, S, D)


# ---------------------------------------------------------------------------
# deterministic params (weights stored bf16 for the MXU; norms/biases f32)
# ---------------------------------------------------------------------------

def init_params(cfg, key):
    D = cfg["hidden_size"]
    C = cfg["num_channels"]
    P = cfg["patch_size"]
    I = cfg["intermediate_size"]
    nps = cfg["image_size"] // P

    def nrm(k, shape, dtype=jnp.bfloat16, s=0.02):
        return (jax.random.normal(k, shape, jnp.float32) * s).astype(dtype)

    keys = iter(jax.random.split(key, 8 + 8 * cfg["num_hidden_layers"]))
    params = {
        "patch_w": nrm(next(keys), (D, C, P, P)),
        "patch_b": nrm(next(keys), (D,), jnp.float32),
        "pos_emb": nrm(next(keys), (nps * nps, D), jnp.float32),
        "post_ln_g": jnp.ones((D,), jnp.float32),
        "post_ln_b": jnp.zeros((D,), jnp.float32),
        "layers": [],
    }
    for _ in range(cfg["num_hidden_layers"]):
        params["layers"].append({
            "ln1_g": jnp.ones((D,), jnp.float32),
            "ln1_b": jnp.zeros((D,), jnp.float32),
            "qkv_w": nrm(next(keys), (D, 3 * D)),
            "qkv_b": nrm(next(keys), (3 * D,), jnp.float32),
            "out_w": nrm(next(keys), (D, D)),
            "out_b": nrm(next(keys), (D,), jnp.float32),
            "ln2_g": jnp.ones((D,), jnp.float32),
            "ln2_b": jnp.zeros((D,), jnp.float32),
            "fc1_w": nrm(next(keys), (D, I)),
            "fc1_b": nrm(next(keys), (I,), jnp.float32),
            "fc2_w": nrm(next(keys), (I, D)),
            "fc2_b": nrm(next(keys), (D,), jnp.float32),
        })
    return params


if __name__ == "__main__":
    cfg = dict(
        hidden_size=32,
        num_attention_heads=4,
        intermediate_size=64,
        num_hidden_layers=2,
        num_channels=3,
        image_size=16,
        patch_size=4,
        layer_norm_eps=1e-6,
        hidden_act="gelu_pytorch_tanh",
        attention_dropout=0.0,  # eval mode: dropout is identity
    )
    key = jax.random.PRNGKey(0)
    k_params, k_x = jax.random.split(key)
    params = init_params(cfg, k_params)

    B = 2
    pixel_values = jax.random.normal(
        k_x, (B, cfg["num_channels"], cfg["image_size"], cfg["image_size"]), jnp.float32
    )

    fwd = jax.jit(functools.partial(idefics3_vision_transformer, cfg=cfg))
    out = jax.block_until_ready(fwd(pixel_values, params))
    assert out.shape == (B, (cfg["image_size"] // cfg["patch_size"]) ** 2, cfg["hidden_size"])
    assert bool(jnp.all(jnp.isfinite(out)))
    print("KERNEL_OK")
</pallas_src>

<mosaic_0001>
module attributes {stable_mosaic.version = 11 : i64} {
  func.func @_patch_embed_kernel(%arg0: i32, %arg1: memref<1x16x48xf32, #tpu.memory_space<vmem>>, %arg2: memref<48x32xbf16, #tpu.memory_space<vmem>>, %arg3: memref<1x32xf32, #tpu.memory_space<vmem>>, %arg4: memref<16x32xf32, #tpu.memory_space<vmem>>, %arg5: memref<1x16x32xbf16, #tpu.memory_space<vmem>>) attributes {dimension_semantics = [#tpu.dimension_semantics<parallel>], iteration_bounds = array<i64: 2>, scalar_prefetch = 0 : i64, scratch_operands = 0 : i64, tpu.core_type = #tpu.core_type<tc>, window_params = [{transform_indices = @transform_0, window_bounds = array<i64: 1, 16, 48>}, {pipeline_mode = #tpu.pipeline_mode<synchronous>, transform_indices = @transform_1, window_bounds = array<i64: 48, 32>}, {pipeline_mode = #tpu.pipeline_mode<synchronous>, transform_indices = @transform_2, window_bounds = array<i64: 1, 32>}, {pipeline_mode = #tpu.pipeline_mode<synchronous>, transform_indices = @transform_3, window_bounds = array<i64: 16, 32>}, {transform_indices = @transform_4, window_bounds = array<i64: 1, 16, 32>}]} {
    %c0 = arith.constant 0 : index
    %c0_0 = arith.constant 0 : index
    %c0_1 = arith.constant 0 : index
    %0 = vector.load %arg1[%c0, %c0_0, %c0_1] : memref<1x16x48xf32, #tpu.memory_space<vmem>>, vector<1x16x48xf32>
    %1 = vector.shape_cast %0 : vector<1x16x48xf32> to vector<16x48xf32>
    %2 = arith.truncf %1 : vector<16x48xf32> to vector<16x48xbf16>
    %c0_2 = arith.constant 0 : index
    %c0_3 = arith.constant 0 : index
    %3 = vector.load %arg2[%c0_2, %c0_3] : memref<48x32xbf16, #tpu.memory_space<vmem>>, vector<48x32xbf16>
    %cst = arith.constant dense<0.000000e+00> : vector<16x32xf32>
    %4 = tpu.matmul %2, %3, %cst {dimension_numbers = #tpu.dot_dimension_numbers<[1], [0], [0], [1], [0, 0, 1, 1], [], []>} : vector<16x48xbf16>, vector<48x32xbf16>, vector<16x32xf32> -> vector<16x32xf32>
    %c0_4 = arith.constant 0 : index
    %c0_5 = arith.constant 0 : index
    %5 = vector.load %arg3[%c0_4, %c0_5] : memref<1x32xf32, #tpu.memory_space<vmem>>, vector<1x32xf32>
    %6 = vector.broadcast %5 : vector<1x32xf32> to vector<16x32xf32>
    %7 = arith.addf %4, %6 : vector<16x32xf32>
    %c0_6 = arith.constant 0 : index
    %c0_7 = arith.constant 0 : index
    %8 = vector.load %arg4[%c0_6, %c0_7] : memref<16x32xf32, #tpu.memory_space<vmem>>, vector<16x32xf32>
    %9 = arith.addf %7, %8 : vector<16x32xf32>
    %10 = arith.truncf %9 : vector<16x32xf32> to vector<16x32xbf16>
    %c0_8 = arith.constant 0 : index
    %c0_9 = arith.constant 0 : index
    %c0_10 = arith.constant 0 : index
    %11 = vector.load %arg5[%c0_8, %c0_9, %c0_10] : memref<1x16x32xbf16, #tpu.memory_space<vmem>>, vector<1x16x32xbf16>
    %12 = vector.shape_cast %11 : vector<1x16x32xbf16> to vector<16x32xbf16>
    %13 = vector.shape_cast %10 : vector<16x32xbf16> to vector<1x16x32xbf16>
    tpu.vector_store %arg5[%c0_8, %c0_9, %c0_10], %13 {strides = array<i32>} : memref<1x16x32xbf16, #tpu.memory_space<vmem>>, vector<1x16x32xbf16>,
    return
  }
  func.func @transform_0(%arg0: i32) -> (i32, i32, i32) {
    %c0_i32 = arith.constant 0 : i32
    %c0_i32_0 = arith.constant 0 : i32
    %c0_i32_1 = arith.constant 0 : i32
    return %arg0, %c0_i32, %c0_i32_0 : i32, i32, i32
  }
  func.func @transform_1(%arg0: i32) -> (i32, i32) {
    %c0_i32 = arith.constant 0 : i32
    %c0_i32_0 = arith.constant 0 : i32
    %c0_i32_1 = arith.constant 0 : i32
    return %c0_i32, %c0_i32_0 : i32, i32
  }
  func.func @transform_2(%arg0: i32) -> (i32, i32) {
    %c0_i32 = arith.constant 0 : i32
    %c0_i32_0 = arith.constant 0 : i32
    %c0_i32_1 = arith.constant 0 : i32
    return %c0_i32, %c0_i32_0 : i32, i32
  }
  func.func @transform_3(%arg0: i32) -> (i32, i32) {
    %c0_i32 = arith.constant 0 : i32
    %c0_i32_0 = arith.constant 0 : i32
    %c0_i32_1 = arith.constant 0 : i32
    return %c0_i32, %c0_i32_0 : i32, i32
  }
  func.func @transform_4(%arg0: i32) -> (i32, i32, i32) {
    %c0_i32 = arith.constant 0 : i32
    %c0_i32_0 = arith.constant 0 : i32
    %c0_i32_1 = arith.constant 0 : i32
    return %arg0, %c0_i32, %c0_i32_0 : i32, i32, i32
  }
}

module attributes {stable_mosaic.version = 11 : i64} {
  func.func @_fused_linear_kernel(%arg0: i32, %arg1: i32, %arg2: memref<32x32xbf16, #tpu.memory_space<vmem>>, %arg3: memref<1x32xf32, #tpu.memory_space<vmem>>, %arg4: memref<1x32xf32, #tpu.memory_space<vmem>>, %arg5: memref<32x96xbf16, #tpu.memory_space<vmem>>, %arg6: memref<1x96xf32, #tpu.memory_space<vmem>>, %arg7: memref<32x96xbf16, #tpu.memory_space<vmem>>, %arg8: memref<32x32xbf16, #tpu.memory_space<vmem>>) attributes {dimension_semantics = [#tpu.dimension_semantics<parallel>, #tpu.dimension_semantics<arbitrary>], iteration_bounds = array<i64: 1, 1>, scalar_prefetch = 0 : i64, scratch_operands = 1 : i64, tpu.core_type = #tpu.core_type<tc>, window_params = [{transform_indices = @transform_0, window_bounds = array<i64: 32, 32>}, {pipeline_mode = #tpu.pipeline_mode<synchronous>, transform_indices = @transform_1, window_bounds = array<i64: 1, 32>}, {pipeline_mode = #tpu.pipeline_mode<synchronous>, transform_indices = @transform_2, window_bounds = array<i64: 1, 32>}, {transform_indices = @transform_3, window_bounds = array<i64: 32, 96>}, {transform_indices = @transform_4, window_bounds = array<i64: 1, 96>}, {transform_indices = @transform_5, window_bounds = array<i64: 32, 96>}]} {
    %c0_i32 = arith.constant 0 : i32
    %0 = arith.cmpi eq, %arg1, %c0_i32 : i32
    %1 = arith.extui %0 : i1 to i32
    %c0_i32_0 = arith.constant 0 : i32
    %2 = arith.cmpi ne, %1, %c0_i32_0 : i32
    scf.if %2 {
      %c0_8 = arith.constant 0 : index
      %c0_9 = arith.constant 0 : index
      %11 = vector.load %arg2[%c0_8, %c0_9] : memref<32x32xbf16, #tpu.memory_space<vmem>>, vector<32x32xbf16>
      %12 = arith.extf %11 : vector<32x32xbf16> to vector<32x32xf32>
      %cst_10 = arith.constant dense<0.000000e+00> : vector<32xf32>
      %13 = vector.multi_reduction <add>, %12, %cst_10 [1] : vector<32x32xf32> to vector<32xf32>
      %14 = vector.shape_cast %13 : vector<32xf32> to vector<32x1xf32>
      %cst_11 = arith.constant 3.200000e+01 : f32
      %15 = vector.broadcast %cst_11 : f32 to vector<32x1xf32>
      %16 = arith.divf %14, %15 : vector<32x1xf32>
      %17 = vector.broadcast %16 : vector<32x1xf32> to vector<32x32xf32>
      %18 = arith.subf %12, %17 : vector<32x32xf32>
      %19 = arith.mulf %18, %18 : vector<32x32xf32>
      %cst_12 = arith.constant dense<0.000000e+00> : vector<32xf32>
      %20 = vector.multi_reduction <add>, %19, %cst_12 [1] : vector<32x32xf32> to vector<32xf32>
      %21 = vector.shape_cast %20 : vector<32xf32> to vector<32x1xf32>
      %cst_13 = arith.constant 3.200000e+01 : f32
      %22 = vector.broadcast %cst_13 : f32 to vector<32x1xf32>
      %23 = arith.divf %21, %22 : vector<32x1xf32>
      %24 = vector.broadcast %16 : vector<32x1xf32> to vector<32x32xf32>
      %25 = arith.subf %12, %24 : vector<32x32xf32>
      %cst_14 = arith.constant 9.99999997E-7 : f32
      %26 = vector.broadcast %cst_14 : f32 to vector<32x1xf32>
      %27 = arith.addf %23, %26 : vector<32x1xf32>
      %28 = math.rsqrt %27 : vector<32x1xf32>
      %29 = vector.broadcast %28 : vector<32x1xf32> to vector<32x32xf32>
      %30 = arith.mulf %25, %29 : vector<32x32xf32>
      %c0_15 = arith.constant 0 : index
      %c0_16 = arith.constant 0 : index
      %31 = vector.load %arg3[%c0_15, %c0_16] : memref<1x32xf32, #tpu.memory_space<vmem>>, vector<1x32xf32>
      %32 = vector.broadcast %31 : vector<1x32xf32> to vector<32x32xf32>
      %33 = arith.mulf %30, %32 : vector<32x32xf32>
      %c0_17 = arith.constant 0 : index
      %c0_18 = arith.constant 0 : index
      %34 = vector.load %arg4[%c0_17, %c0_18] : memref<1x32xf32, #tpu.memory_space<vmem>>, vector<1x32xf32>
      %35 = vector.broadcast %34 : vector<1x32xf32> to vector<32x32xf32>
      %36 = arith.addf %33, %35 : vector<32x32xf32>
      %37 = arith.truncf %36 : vector<32x32xf32> to vector<32x32xbf16>
      %c0_19 = arith.constant 0 : index
      %c0_20 = arith.constant 0 : index
      %38 = vector.load %arg8[%c0_19, %c0_20] : memref<32x32xbf16, #tpu.memory_space<vmem>>, vector<32x32xbf16>
      tpu.vector_store %arg8[%c0_19, %c0_20], %37 {strides = array<i32>} : memref<32x32xbf16, #tpu.memory_space<vmem>>, vector<32x32xbf16>,
    } else {
    }
    %c0 = arith.constant 0 : index
    %c0_1 = arith.constant 0 : index
    %3 = vector.load %arg8[%c0, %c0_1] : memref<32x32xbf16, #tpu.memory_space<vmem>>, vector<32x32xbf16>
    %c0_2 = arith.constant 0 : index
    %c0_3 = arith.constant 0 : index
    %4 = vector.load %arg5[%c0_2, %c0_3] : memref<32x96xbf16, #tpu.memory_space<vmem>>, vector<32x96xbf16>
    %cst = arith.constant dense<0.000000e+00> : vector<32x96xf32>
    %5 = tpu.matmul %3, %4, %cst {dimension_numbers = #tpu.dot_dimension_numbers<[1], [0], [0], [1], [0, 0, 1, 1], [], []>} : vector<32x32xbf16>, vector<32x96xbf16>, vector<32x96xf32> -> vector<32x96xf32>
    %c0_4 = arith.constant 0 : index
    %c0_5 = arith.constant 0 : index
    %6 = vector.load %arg6[%c0_4, %c0_5] : memref<1x96xf32, #tpu.memory_space<vmem>>, vector<1x96xf32>
    %7 = vector.broadcast %6 : vector<1x96xf32> to vector<32x96xf32>
    %8 = arith.addf %5, %7 : vector<32x96xf32>
    %9 = arith.truncf %8 : vector<32x96xf32> to vector<32x96xbf16>
    %c0_6 = arith.constant 0 : index
    %c0_7 = arith.constant 0 : index
    %10 = vector.load %arg7[%c0_6, %c0_7] : memref<32x96xbf16, #tpu.memory_space<vmem>>, vector<32x96xbf16>
    tpu.vector_store %arg7[%c0_6, %c0_7], %9 {strides = array<i32>} : memref<32x96xbf16, #tpu.memory_space<vmem>>, vector<32x96xbf16>,
    return
  }
  func.func @transform_0(%arg0: i32, %arg1: i32) -> (i32, i32) {
    %c0_i32 = arith.constant 0 : i32
    %c0_i32_0 = arith.constant 0 : i32
    return %arg0, %c0_i32 : i32, i32
  }
  func.func @transform_1(%arg0: i32, %arg1: i32) -> (i32, i32) {
    %c0_i32 = arith.constant 0 : i32
    %c0_i32_0 = arith.constant 0 : i32
    %c0_i32_1 = arith.constant 0 : i32
    return %c0_i32, %c0_i32_0 : i32, i32
  }
  func.func @transform_2(%arg0: i32, %arg1: i32) -> (i32, i32) {
    %c0_i32 = arith.constant 0 : i32
    %c0_i32_0 = arith.constant 0 : i32
    %c0_i32_1 = arith.constant 0 : i32
    return %c0_i32, %c0_i32_0 : i32, i32
  }
  func.func @transform_3(%arg0: i32, %arg1: i32) -> (i32, i32) {
    %c0_i32 = arith.constant 0 : i32
    %c0_i32_0 = arith.constant 0 : i32
    return %c0_i32, %arg1 : i32, i32
  }
  func.func @transform_4(%arg0: i32, %arg1: i32) -> (i32, i32) {
    %c0_i32 = arith.constant 0 : i32
    %c0_i32_0 = arith.constant 0 : i32
    return %c0_i32, %arg1 : i32, i32
  }
  func.func @transform_5(%arg0: i32, %arg1: i32) -> (i32, i32) {
    %c0_i32 = arith.constant 0 : i32
    return %arg0, %arg1 : i32, i32
  }
}

module attributes {stable_mosaic.version = 11 : i64} {
  func.func @_attn_kernel(%arg0: i32, %arg1: i32, %arg2: memref<3x1x1x16x8xbf16, #tpu.memory_space<vmem>>, %arg3: memref<1x1x16x8xbf16, #tpu.memory_space<vmem>>) attributes {dimension_semantics = [#tpu.dimension_semantics<parallel>, #tpu.dimension_semantics<parallel>], iteration_bounds = array<i64: 2, 4>, scalar_prefetch = 0 : i64, scratch_operands = 0 : i64, tpu.core_type = #tpu.core_type<tc>, window_params = [{transform_indices = @transform_0, window_bounds = array<i64: 3, 1, 1, 16, 8>}, {transform_indices = @transform_1, window_bounds = array<i64: 1, 1, 16, 8>}]} {
    %c0 = arith.constant 0 : index
    %c0_0 = arith.constant 0 : index
    %c0_1 = arith.constant 0 : index
    %c0_2 = arith.constant 0 : index
    %c0_3 = arith.constant 0 : index
    %0 = vector.load %arg2[%c0, %c0_0, %c0_1, %c0_2, %c0_3] : memref<3x1x1x16x8xbf16, #tpu.memory_space<vmem>>, vector<1x1x1x16x8xbf16>
    %1 = vector.shape_cast %0 : vector<1x1x1x16x8xbf16> to vector<16x8xbf16>
    %c1 = arith.constant 1 : index
    %c0_4 = arith.constant 0 : index
    %c0_5 = arith.constant 0 : index
    %c0_6 = arith.constant 0 : index
    %c0_7 = arith.constant 0 : index
    %2 = vector.load %arg2[%c1, %c0_4, %c0_5, %c0_6, %c0_7] : memref<3x1x1x16x8xbf16, #tpu.memory_space<vmem>>, vector<1x1x1x16x8xbf16>
    %3 = vector.shape_cast %2 : vector<1x1x1x16x8xbf16> to vector<16x8xbf16>
    %c2 = arith.constant 2 : index
    %c0_8 = arith.constant 0 : index
    %c0_9 = arith.constant 0 : index
    %c0_10 = arith.constant 0 : index
    %c0_11 = arith.constant 0 : index
    %4 = vector.load %arg2[%c2, %c0_8, %c0_9, %c0_10, %c0_11] : memref<3x1x1x16x8xbf16, #tpu.memory_space<vmem>>, vector<1x1x1x16x8xbf16>
    %5 = vector.shape_cast %4 : vector<1x1x1x16x8xbf16> to vector<16x8xbf16>
    %cst = arith.constant dense<0.000000e+00> : vector<16x16xf32>
    %6 = tpu.matmul %1, %3, %cst {dimension_numbers = #tpu.dot_dimension_numbers<[1], [1], [0], [0], [0, 0, 1, 0], [], []>} : vector<16x8xbf16>, vector<16x8xbf16>, vector<16x16xf32> -> vector<16x16xf32>
    %cst_12 = arith.constant 0.353553385 : f32
    %7 = vector.broadcast %cst_12 : f32 to vector<16x16xf32>
    %8 = arith.mulf %6, %7 : vector<16x16xf32>
    %cst_13 = arith.constant dense<0xFF800000> : vector<16xf32>
    %9 = vector.multi_reduction <maximumf>, %8, %cst_13 [1] : vector<16x16xf32> to vector<16xf32>
    %10 = vector.shape_cast %9 : vector<16xf32> to vector<16x1xf32>
    %11 = vector.broadcast %10 : vector<16x1xf32> to vector<16x16xf32>
    %12 = arith.subf %8, %11 : vector<16x16xf32>
    %13 = arith.truncf %12 : vector<16x16xf32> to vector<16x16xbf16>
    %14 = math.exp %13 : vector<16x16xbf16>
    %15 = arith.extf %14 : vector<16x16xbf16> to vector<16x16xf32>
    %cst_14 = arith.constant dense<0.000000e+00> : vector<16xf32>
    %16 = vector.multi_reduction <add>, %15, %cst_14 [1] : vector<16x16xf32> to vector<16xf32>
    %17 = vector.shape_cast %16 : vector<16xf32> to vector<16x1xf32>
    %cst_15 = arith.constant dense<0.000000e+00> : vector<16x8xf32>
    %18 = tpu.matmul %14, %5, %cst_15 {dimension_numbers = #tpu.dot_dimension_numbers<[1], [0], [0], [1], [0, 0, 1, 1], [], []>} : vector<16x16xbf16>, vector<16x8xbf16>, vector<16x8xf32> -> vector<16x8xf32>
    %19 = tpu.reciprocal %17 {approx = true} : vector<16x1xf32> -> vector<16x1xf32>
    %20 = vector.broadcast %19 : vector<16x1xf32> to vector<16x8xf32>
    %21 = arith.mulf %18, %20 : vector<16x8xf32>
    %22 = arith.truncf %21 : vector<16x8xf32> to vector<16x8xbf16>
    %c0_16 = arith.constant 0 : index
    %c0_17 = arith.constant 0 : index
    %c0_18 = arith.constant 0 : index
    %c0_19 = arith.constant 0 : index
    %23 = vector.load %arg3[%c0_16, %c0_17, %c0_18, %c0_19] : memref<1x1x16x8xbf16, #tpu.memory_space<vmem>>, vector<1x1x16x8xbf16>
    %24 = vector.shape_cast %23 : vector<1x1x16x8xbf16> to vector<16x8xbf16>
    %25 = vector.shape_cast %22 : vector<16x8xbf16> to vector<1x1x16x8xbf16>
    tpu.vector_store %arg3[%c0_16, %c0_17, %c0_18, %c0_19], %25 {strides = array<i32>} : memref<1x1x16x8xbf16, #tpu.memory_space<vmem>>, vector<1x1x16x8xbf16>,
    return
  }
  func.func @transform_0(%arg0: i32, %arg1: i32) -> (i32, i32, i32, i32, i32) {
    %c0_i32 = arith.constant 0 : i32
    %c0_i32_0 = arith.constant 0 : i32
    %c0_i32_1 = arith.constant 0 : i32
    %c0_i32_2 = arith.constant 0 : i32
    return %c0_i32, %arg0, %arg1, %c0_i32_0, %c0_i32_1 : i32, i32, i32, i32, i32
  }
  func.func @transform_1(%arg0: i32, %arg1: i32) -> (i32, i32, i32, i32) {
    %c0_i32 = arith.constant 0 : i32
    %c0_i32_0 = arith.constant 0 : i32
    %c0_i32_1 = arith.constant 0 : i32
    return %arg0, %arg1, %c0_i32, %c0_i32_0 : i32, i32, i32, i32
  }
}

module attributes {stable_mosaic.version = 11 : i64} {
  func.func @_fused_linear_kernel(%arg0: i32, %arg1: i32, %arg2: memref<32x32xbf16, #tpu.memory_space<vmem>>, %arg3: memref<32x32xbf16, #tpu.memory_space<vmem>>, %arg4: memref<1x32xf32, #tpu.memory_space<vmem>>, %arg5: memref<32x32xbf16, #tpu.memory_space<vmem>>, %arg6: memref<32x32xbf16, #tpu.memory_space<vmem>>) attributes {dimension_semantics = [#tpu.dimension_semantics<parallel>, #tpu.dimension_semantics<arbitrary>], iteration_bounds = array<i64: 1, 1>, scalar_prefetch = 0 : i64, scratch_operands = 0 : i64, tpu.core_type = #tpu.core_type<tc>, window_params = [{transform_indices = @transform_0, window_bounds = array<i64: 32, 32>}, {transform_indices = @transform_1, window_bounds = array<i64: 32, 32>}, {transform_indices = @transform_2, window_bounds = array<i64: 1, 32>}, {transform_indices = @transform_3, window_bounds = array<i64: 32, 32>}, {transform_indices = @transform_4, window_bounds = array<i64: 32, 32>}]} {
    %c0 = arith.constant 0 : index
    %c0_0 = arith.constant 0 : index
    %0 = vector.load %arg2[%c0, %c0_0] : memref<32x32xbf16, #tpu.memory_space<vmem>>, vector<32x32xbf16>
    %c0_1 = arith.constant 0 : index
    %c0_2 = arith.constant 0 : index
    %1 = vector.load %arg3[%c0_1, %c0_2] : memref<32x32xbf16, #tpu.memory_space<vmem>>, vector<32x32xbf16>
    %cst = arith.constant dense<0.000000e+00> : vector<32x32xf32>
    %2 = tpu.matmul %0, %1, %cst {dimension_numbers = #tpu.dot_dimension_numbers<[1], [0], [0], [1], [0, 0, 1, 1], [], []>} : vector<32x32xbf16>, vector<32x32xbf16>, vector<32x32xf32> -> vector<32x32xf32>
    %c0_3 = arith.constant 0 : index
    %c0_4 = arith.constant 0 : index
    %3 = vector.load %arg4[%c0_3, %c0_4] : memref<1x32xf32, #tpu.memory_space<vmem>>, vector<1x32xf32>
    %4 = vector.broadcast %3 : vector<1x32xf32> to vector<32x32xf32>
    %5 = arith.addf %2, %4 : vector<32x32xf32>
    %c0_5 = arith.constant 0 : index
    %c0_6 = arith.constant 0 : index
    %6 = vector.load %arg5[%c0_5, %c0_6] : memref<32x32xbf16, #tpu.memory_space<vmem>>, vector<32x32xbf16>
    %7 = arith.extf %6 : vector<32x32xbf16> to vector<32x32xf32>
    %8 = arith.addf %5, %7 : vector<32x32xf32>
    %9 = arith.truncf %8 : vector<32x32xf32> to vector<32x32xbf16>
    %c0_7 = arith.constant 0 : index
    %c0_8 = arith.constant 0 : index
    %10 = vector.load %arg6[%c0_7, %c0_8] : memref<32x32xbf16, #tpu.memory_space<vmem>>, vector<32x32xbf16>
    tpu.vector_store %arg6[%c0_7, %c0_8], %9 {strides = array<i32>} : memref<32x32xbf16, #tpu.memory_space<vmem>>, vector<32x32xbf16>,
    return
  }
  func.func @transform_0(%arg0: i32, %arg1: i32) -> (i32, i32) {
    %c0_i32 = arith.constant 0 : i32
    %c0_i32_0 = arith.constant 0 : i32
    return %arg0, %c0_i32 : i32, i32
  }
  func.func @transform_1(%arg0: i32, %arg1: i32) -> (i32, i32) {
    %c0_i32 = arith.constant 0 : i32
    %c0_i32_0 = arith.constant 0 : i32
    return %c0_i32, %arg1 : i32, i32
  }
  func.func @transform_2(%arg0: i32, %arg1: i32) -> (i32, i32) {
    %c0_i32 = arith.constant 0 : i32
    %c0_i32_0 = arith.constant 0 : i32
    return %c0_i32, %arg1 : i32, i32
  }
  func.func @transform_3(%arg0: i32, %arg1: i32) -> (i32, i32) {
    %c0_i32 = arith.constant 0 : i32
    return %arg0, %arg1 : i32, i32
  }
  func.func @transform_4(%arg0: i32, %arg1: i32) -> (i32, i32) {
    %c0_i32 = arith.constant 0 : i32
    return %arg0, %arg1 : i32, i32
  }
}

module attributes {stable_mosaic.version = 11 : i64} {
  func.func @_fused_linear_kernel(%arg0: i32, %arg1: i32, %arg2: memref<32x32xbf16, #tpu.memory_space<vmem>>, %arg3: memref<1x32xf32, #tpu.memory_space<vmem>>, %arg4: memref<1x32xf32, #tpu.memory_space<vmem>>, %arg5: memref<32x64xbf16, #tpu.memory_space<vmem>>, %arg6: memref<1x64xf32, #tpu.memory_space<vmem>>, %arg7: memref<32x64xbf16, #tpu.memory_space<vmem>>, %arg8: memref<32x32xbf16, #tpu.memory_space<vmem>>) attributes {dimension_semantics = [#tpu.dimension_semantics<parallel>, #tpu.dimension_semantics<arbitrary>], iteration_bounds = array<i64: 1, 1>, scalar_prefetch = 0 : i64, scratch_operands = 1 : i64, tpu.core_type = #tpu.core_type<tc>, window_params = [{transform_indices = @transform_0, window_bounds = array<i64: 32, 32>}, {pipeline_mode = #tpu.pipeline_mode<synchronous>, transform_indices = @transform_1, window_bounds = array<i64: 1, 32>}, {pipeline_mode = #tpu.pipeline_mode<synchronous>, transform_indices = @transform_2, window_bounds = array<i64: 1, 32>}, {transform_indices = @transform_3, window_bounds = array<i64: 32, 64>}, {transform_indices = @transform_4, window_bounds = array<i64: 1, 64>}, {transform_indices = @transform_5, window_bounds = array<i64: 32, 64>}]} {
    %c0_i32 = arith.constant 0 : i32
    %0 = arith.cmpi eq, %arg1, %c0_i32 : i32
    %1 = arith.extui %0 : i1 to i32
    %c0_i32_0 = arith.constant 0 : i32
    %2 = arith.cmpi ne, %1, %c0_i32_0 : i32
    scf.if %2 {
      %c0_12 = arith.constant 0 : index
      %c0_13 = arith.constant 0 : index
      %24 = vector.load %arg2[%c0_12, %c0_13] : memref<32x32xbf16, #tpu.memory_space<vmem>>, vector<32x32xbf16>
      %25 = arith.extf %24 : vector<32x32xbf16> to vector<32x32xf32>
      %cst_14 = arith.constant dense<0.000000e+00> : vector<32xf32>
      %26 = vector.multi_reduction <add>, %25, %cst_14 [1] : vector<32x32xf32> to vector<32xf32>
      %27 = vector.shape_cast %26 : vector<32xf32> to vector<32x1xf32>
      %cst_15 = arith.constant 3.200000e+01 : f32
      %28 = vector.broadcast %cst_15 : f32 to vector<32x1xf32>
      %29 = arith.divf %27, %28 : vector<32x1xf32>
      %30 = vector.broadcast %29 : vector<32x1xf32> to vector<32x32xf32>
      %31 = arith.subf %25, %30 : vector<32x32xf32>
      %32 = arith.mulf %31, %31 : vector<32x32xf32>
      %cst_16 = arith.constant dense<0.000000e+00> : vector<32xf32>
      %33 = vector.multi_reduction <add>, %32, %cst_16 [1] : vector<32x32xf32> to vector<32xf32>
      %34 = vector.shape_cast %33 : vector<32xf32> to vector<32x1xf32>
      %cst_17 = arith.constant 3.200000e+01 : f32
      %35 = vector.broadcast %cst_17 : f32 to vector<32x1xf32>
      %36 = arith.divf %34, %35 : vector<32x1xf32>
      %37 = vector.broadcast %29 : vector<32x1xf32> to vector<32x32xf32>
      %38 = arith.subf %25, %37 : vector<32x32xf32>
      %cst_18 = arith.constant 9.99999997E-7 : f32
      %39 = vector.broadcast %cst_18 : f32 to vector<32x1xf32>
      %40 = arith.addf %36, %39 : vector<32x1xf32>
      %41 = math.rsqrt %40 : vector<32x1xf32>
      %42 = vector.broadcast %41 : vector<32x1xf32> to vector<32x32xf32>
      %43 = arith.mulf %38, %42 : vector<32x32xf32>
      %c0_19 = arith.constant 0 : index
      %c0_20 = arith.constant 0 : index
      %44 = vector.load %arg3[%c0_19, %c0_20] : memref<1x32xf32, #tpu.memory_space<vmem>>, vector<1x32xf32>
      %45 = vector.broadcast %44 : vector<1x32xf32> to vector<32x32xf32>
      %46 = arith.mulf %43, %45 : vector<32x32xf32>
      %c0_21 = arith.constant 0 : index
      %c0_22 = arith.constant 0 : index
      %47 = vector.load %arg4[%c0_21, %c0_22] : memref<1x32xf32, #tpu.memory_space<vmem>>, vector<1x32xf32>
      %48 = vector.broadcast %47 : vector<1x32xf32> to vector<32x32xf32>
      %49 = arith.addf %46, %48 : vector<32x32xf32>
      %50 = arith.truncf %49 : vector<32x32xf32> to vector<32x32xbf16>
      %c0_23 = arith.constant 0 : index
      %c0_24 = arith.constant 0 : index
      %51 = vector.load %arg8[%c0_23, %c0_24] : memref<32x32xbf16, #tpu.memory_space<vmem>>, vector<32x32xbf16>
      tpu.vector_store %arg8[%c0_23, %c0_24], %50 {strides = array<i32>} : memref<32x32xbf16, #tpu.memory_space<vmem>>, vector<32x32xbf16>,
    } else {
    }
    %c0 = arith.constant 0 : index
    %c0_1 = arith.constant 0 : index
    %3 = vector.load %arg8[%c0, %c0_1] : memref<32x32xbf16, #tpu.memory_space<vmem>>, vector<32x32xbf16>
    %c0_2 = arith.constant 0 : index
    %c0_3 = arith.constant 0 : index
    %4 = vector.load %arg5[%c0_2, %c0_3] : memref<32x64xbf16, #tpu.memory_space<vmem>>, vector<32x64xbf16>
    %cst = arith.constant dense<0.000000e+00> : vector<32x64xf32>
    %5 = tpu.matmul %3, %4, %cst {dimension_numbers = #tpu.dot_dimension_numbers<[1], [0], [0], [1], [0, 0, 1, 1], [], []>} : vector<32x32xbf16>, vector<32x64xbf16>, vector<32x64xf32> -> vector<32x64xf32>
    %c0_4 = arith.constant 0 : index
    %c0_5 = arith.constant 0 : index
    %6 = vector.load %arg6[%c0_4, %c0_5] : memref<1x64xf32, #tpu.memory_space<vmem>>, vector<1x64xf32>
    %7 = vector.broadcast %6 : vector<1x64xf32> to vector<32x64xf32>
    %8 = arith.addf %5, %7 : vector<32x64xf32>
    %cst_6 = arith.constant 5.000000e-01 : f32
    %9 = vector.broadcast %cst_6 : f32 to vector<32x64xf32>
    %10 = arith.mulf %9, %8 : vector<32x64xf32>
    %cst_7 = arith.constant 4.471500e-02 : f32
    %11 = vector.broadcast %cst_7 : f32 to vector<32x64xf32>
    %12 = arith.mulf %11, %8 : vector<32x64xf32>
    %13 = arith.mulf %12, %8 : vector<32x64xf32>
    %14 = arith.mulf %13, %8 : vector<32x64xf32>
    %15 = arith.addf %8, %14 : vector<32x64xf32>
    %cst_8 = arith.constant 0.797884583 : f32
    %16 = vector.broadcast %cst_8 : f32 to vector<32x64xf32>
    %17 = arith.mulf %16, %15 : vector<32x64xf32>
    %18 = math.tanh %17 : vector<32x64xf32>
    %cst_9 = arith.constant 1.000000e+00 : f32
    %19 = vector.broadcast %cst_9 : f32 to vector<32x64xf32>
    %20 = arith.addf %19, %18 : vector<32x64xf32>
    %21 = arith.mulf %10, %20 : vector<32x64xf32>
    %22 = arith.truncf %21 : vector<32x64xf32> to vector<32x64xbf16>
    %c0_10 = arith.constant 0 : index
    %c0_11 = arith.constant 0 : index
    %23 = vector.load %arg7[%c0_10, %c0_11] : memref<32x64xbf16, #tpu.memory_space<vmem>>, vector<32x64xbf16>
    tpu.vector_store %arg7[%c0_10, %c0_11], %22 {strides = array<i32>} : memref<32x64xbf16, #tpu.memory_space<vmem>>, vector<32x64xbf16>,
    return
  }
  func.func @transform_0(%arg0: i32, %arg1: i32) -> (i32, i32) {
    %c0_i32 = arith.constant 0 : i32
    %c0_i32_0 = arith.constant 0 : i32
    return %arg0, %c0_i32 : i32, i32
  }
  func.func @transform_1(%arg0: i32, %arg1: i32) -> (i32, i32) {
    %c0_i32 = arith.constant 0 : i32
    %c0_i32_0 = arith.constant 0 : i32
    %c0_i32_1 = arith.constant 0 : i32
    return %c0_i32, %c0_i32_0 : i32, i32
  }
  func.func @transform_2(%arg0: i32, %arg1: i32) -> (i32, i32) {
    %c0_i32 = arith.constant 0 : i32
    %c0_i32_0 = arith.constant 0 : i32
    %c0_i32_1 = arith.constant 0 : i32
    return %c0_i32, %c0_i32_0 : i32, i32
  }
  func.func @transform_3(%arg0: i32, %arg1: i32) -> (i32, i32) {
    %c0_i32 = arith.constant 0 : i32
    %c0_i32_0 = arith.constant 0 : i32
    return %c0_i32, %arg1 : i32, i32
  }
  func.func @transform_4(%arg0: i32, %arg1: i32) -> (i32, i32) {
    %c0_i32 = arith.constant 0 : i32
    %c0_i32_0 = arith.constant 0 : i32
    return %c0_i32, %arg1 : i32, i32
  }
  func.func @transform_5(%arg0: i32, %arg1: i32) -> (i32, i32) {
    %c0_i32 = arith.constant 0 : i32
    return %arg0, %arg1 : i32, i32
  }
}

module attributes {stable_mosaic.version = 11 : i64} {
  func.func @_fused_linear_kernel(%arg0: i32, %arg1: i32, %arg2: memref<32x64xbf16, #tpu.memory_space<vmem>>, %arg3: memref<64x32xbf16, #tpu.memory_space<vmem>>, %arg4: memref<1x32xf32, #tpu.memory_space<vmem>>, %arg5: memref<32x32xbf16, #tpu.memory_space<vmem>>, %arg6: memref<32x32xbf16, #tpu.memory_space<vmem>>) attributes {dimension_semantics = [#tpu.dimension_semantics<parallel>, #tpu.dimension_semantics<arbitrary>], iteration_bounds = array<i64: 1, 1>, scalar_prefetch = 0 : i64, scratch_operands = 0 : i64, tpu.core_type = #tpu.core_type<tc>, window_params = [{transform_indices = @transform_0, window_bounds = array<i64: 32, 64>}, {transform_indices = @transform_1, window_bounds = array<i64: 64, 32>}, {transform_indices = @transform_2, window_bounds = array<i64: 1, 32>}, {transform_indices = @transform_3, window_bounds = array<i64: 32, 32>}, {transform_indices = @transform_4, window_bounds = array<i64: 32, 32>}]} {
    %c0 = arith.constant 0 : index
    %c0_0 = arith.constant 0 : index
    %0 = vector.load %arg2[%c0, %c0_0] : memref<32x64xbf16, #tpu.memory_space<vmem>>, vector<32x64xbf16>
    %c0_1 = arith.constant 0 : index
    %c0_2 = arith.constant 0 : index
    %1 = vector.load %arg3[%c0_1, %c0_2] : memref<64x32xbf16, #tpu.memory_space<vmem>>, vector<64x32xbf16>
    %cst = arith.constant dense<0.000000e+00> : vector<32x32xf32>
    %2 = tpu.matmul %0, %1, %cst {dimension_numbers = #tpu.dot_dimension_numbers<[1], [0], [0], [1], [0, 0, 1, 1], [], []>} : vector<32x64xbf16>, vector<64x32xbf16>, vector<32x32xf32> -> vector<32x32xf32>
    %c0_3 = arith.constant 0 : index
    %c0_4 = arith.constant 0 : index
    %3 = vector.load %arg4[%c0_3, %c0_4] : memref<1x32xf32, #tpu.memory_space<vmem>>, vector<1x32xf32>
    %4 = vector.broadcast %3 : vector<1x32xf32> to vector<32x32xf32>
    %5 = arith.addf %2, %4 : vector<32x32xf32>
    %c0_5 = arith.constant 0 : index
    %c0_6 = arith.constant 0 : index
    %6 = vector.load %arg5[%c0_5, %c0_6] : memref<32x32xbf16, #tpu.memory_space<vmem>>, vector<32x32xbf16>
    %7 = arith.extf %6 : vector<32x32xbf16> to vector<32x32xf32>
    %8 = arith.addf %5, %7 : vector<32x32xf32>
    %9 = arith.truncf %8 : vector<32x32xf32> to vector<32x32xbf16>
    %c0_7 = arith.constant 0 : index
    %c0_8 = arith.constant 0 : index
    %10 = vector.load %arg6[%c0_7, %c0_8] : memref<32x32xbf16, #tpu.memory_space<vmem>>, vector<32x32xbf16>
    tpu.vector_store %arg6[%c0_7, %c0_8], %9 {strides = array<i32>} : memref<32x32xbf16, #tpu.memory_space<vmem>>, vector<32x32xbf16>,
    return
  }
  func.func @transform_0(%arg0: i32, %arg1: i32) -> (i32, i32) {
    %c0_i32 = arith.constant 0 : i32
    %c0_i32_0 = arith.constant 0 : i32
    return %arg0, %c0_i32 : i32, i32
  }
  func.func @transform_1(%arg0: i32, %arg1: i32) -> (i32, i32) {
    %c0_i32 = arith.constant 0 : i32
    %c0_i32_0 = arith.constant 0 : i32
    return %c0_i32, %arg1 : i32, i32
  }
  func.func @transform_2(%arg0: i32, %arg1: i32) -> (i32, i32) {
    %c0_i32 = arith.constant 0 : i32
    %c0_i32_0 = arith.constant 0 : i32
    return %c0_i32, %arg1 : i32, i32
  }
  func.func @transform_3(%arg0: i32, %arg1: i32) -> (i32, i32) {
    %c0_i32 = arith.constant 0 : i32
    return %arg0, %arg1 : i32, i32
  }
  func.func @transform_4(%arg0: i32, %arg1: i32) -> (i32, i32) {
    %c0_i32 = arith.constant 0 : i32
    return %arg0, %arg1 : i32, i32
  }
}

module attributes {stable_mosaic.version = 11 : i64} {
  func.func @_layernorm_kernel(%arg0: i32, %arg1: memref<32x32xbf16, #tpu.memory_space<vmem>>, %arg2: memref<1x32xf32, #tpu.memory_space<vmem>>, %arg3: memref<1x32xf32, #tpu.memory_space<vmem>>, %arg4: memref<32x32xf32, #tpu.memory_space<vmem>>) attributes {dimension_semantics = [#tpu.dimension_semantics<parallel>], iteration_bounds = array<i64: 1>, scalar_prefetch = 0 : i64, scratch_operands = 0 : i64, tpu.core_type = #tpu.core_type<tc>, window_params = [{transform_indices = @transform_0, window_bounds = array<i64: 32, 32>}, {pipeline_mode = #tpu.pipeline_mode<synchronous>, transform_indices = @transform_1, window_bounds = array<i64: 1, 32>}, {pipeline_mode = #tpu.pipeline_mode<synchronous>, transform_indices = @transform_2, window_bounds = array<i64: 1, 32>}, {transform_indices = @transform_3, window_bounds = array<i64: 32, 32>}]} {
    %c0 = arith.constant 0 : index
    %c0_0 = arith.constant 0 : index
    %0 = vector.load %arg1[%c0, %c0_0] : memref<32x32xbf16, #tpu.memory_space<vmem>>, vector<32x32xbf16>
    %1 = arith.extf %0 : vector<32x32xbf16> to vector<32x32xf32>
    %cst = arith.constant dense<0.000000e+00> : vector<32xf32>
    %2 = vector.multi_reduction <add>, %1, %cst [1] : vector<32x32xf32> to vector<32xf32>
    %3 = vector.shape_cast %2 : vector<32xf32> to vector<32x1xf32>
    %cst_1 = arith.constant 3.200000e+01 : f32
    %4 = vector.broadcast %cst_1 : f32 to vector<32x1xf32>
    %5 = arith.divf %3, %4 : vector<32x1xf32>
    %6 = vector.broadcast %5 : vector<32x1xf32> to vector<32x32xf32>
    %7 = arith.subf %1, %6 : vector<32x32xf32>
    %8 = arith.mulf %7, %7 : vector<32x32xf32>
    %cst_2 = arith.constant dense<0.000000e+00> : vector<32xf32>
    %9 = vector.multi_reduction <add>, %8, %cst_2 [1] : vector<32x32xf32> to vector<32xf32>
    %10 = vector.shape_cast %9 : vector<32xf32> to vector<32x1xf32>
    %cst_3 = arith.constant 3.200000e+01 : f32
    %11 = vector.broadcast %cst_3 : f32 to vector<32x1xf32>
    %12 = arith.divf %10, %11 : vector<32x1xf32>
    %13 = vector.broadcast %5 : vector<32x1xf32> to vector<32x32xf32>
    %14 = arith.subf %1, %13 : vector<32x32xf32>
    %cst_4 = arith.constant 9.99999997E-7 : f32
    %15 = vector.broadcast %cst_4 : f32 to vector<32x1xf32>
    %16 = arith.addf %12, %15 : vector<32x1xf32>
    %17 = math.rsqrt %16 : vector<32x1xf32>
    %18 = vector.broadcast %17 : vector<32x1xf32> to vector<32x32xf32>
    %19 = arith.mulf %14, %18 : vector<32x32xf32>
    %c0_5 = arith.constant 0 : index
    %c0_6 = arith.constant 0 : index
    %20 = vector.load %arg2[%c0_5, %c0_6] : memref<1x32xf32, #tpu.memory_space<vmem>>, vector<1x32xf32>
    %21 = vector.broadcast %20 : vector<1x32xf32> to vector<32x32xf32>
    %22 = arith.mulf %19, %21 : vector<32x32xf32>
    %c0_7 = arith.constant 0 : index
    %c0_8 = arith.constant 0 : index
    %23 = vector.load %arg3[%c0_7, %c0_8] : memref<1x32xf32, #tpu.memory_space<vmem>>, vector<1x32xf32>
    %24 = vector.broadcast %23 : vector<1x32xf32> to vector<32x32xf32>
    %25 = arith.addf %22, %24 : vector<32x32xf32>
    %c0_9 = arith.constant 0 : index
    %c0_10 = arith.constant 0 : index
    %26 = vector.load %arg4[%c0_9, %c0_10] : memref<32x32xf32, #tpu.memory_space<vmem>>, vector<32x32xf32>
    tpu.vector_store %arg4[%c0_9, %c0_10], %25 {strides = array<i32>} : memref<32x32xf32, #tpu.memory_space<vmem>>, vector<32x32xf32>,
    return
  }
  func.func @transform_0(%arg0: i32) -> (i32, i32) {
    %c0_i32 = arith.constant 0 : i32
    %c0_i32_0 = arith.constant 0 : i32
    return %arg0, %c0_i32 : i32, i32
  }
  func.func @transform_1(%arg0: i32) -> (i32, i32) {
    %c0_i32 = arith.constant 0 : i32
    %c0_i32_0 = arith.constant 0 : i32
    %c0_i32_1 = arith.constant 0 : i32
    return %c0_i32, %c0_i32_0 : i32, i32
  }
  func.func @transform_2(%arg0: i32) -> (i32, i32) {
    %c0_i32 = arith.constant 0 : i32
    %c0_i32_0 = arith.constant 0 : i32
    %c0_i32_1 = arith.constant 0 : i32
    return %c0_i32, %c0_i32_0 : i32, i32
  }
  func.func @transform_3(%arg0: i32) -> (i32, i32) {
    %c0_i32 = arith.constant 0 : i32
    %c0_i32_0 = arith.constant 0 : i32
    return %arg0, %c0_i32 : i32, i32
  }
}

</mosaic_0001>

<bundles_post_ra>
// kernel: custom-call
= control target key start
LH: loop header
LB: loop body
LE: loop exit
PB: predicated region body
PF: predicated region fallthrough
CT: control target
= control target key end

     0   :  { %s6_s0 = inlined_call_operand.vmem [shape: u32[4], index: 0, kind: output, shape index: {}]  }

// kernel: idefics3_vision_transformer.13
= control target key start
LH: loop header
LB: loop body
LE: loop exit
PB: predicated region body
PF: predicated region fallthrough
CT: control target
= control target key end

     0   :  { %vm33_vm0 = vcmask 261120   ;;  %vm210_vm1 = vcmask 781312   ;;  %s340_s0 = inlined_call_operand.vmem [shape: bf16[32,32], index: 0, kind: input, shape index: {}]   ;;  %s341_s3 = inlined_call_operand.vmem [shape: bf16[32,96], index: 3, kind: input, shape index: {}]   ;;  %s342_s1 = inlined_call_operand.vmem [shape: f32[1,32], index: 1, kind: input, shape index: {}]   ;;  %s343_s2 = inlined_call_operand.vmem [shape: f32[1,32], index: 2, kind: input, shape index: {}]   ;;  %s344_s4 = inlined_call_operand.vmem [shape: f32[1,96], index: 4, kind: input, shape index: {}]   ;;  %s345_s5 = inlined_call_operand.vmem [shape: bf16[32,96], index: 5, kind: output, shape index: {}]  }
   0x1   :  { %v235_v0 = vld [vmem:[%s340_s0] sm:$0xff]   ;;  %v242_v1 = vld [vmem:[%s340_s0 + $0x8] sm:$0xff]  }
   0x2   :  { %v236_v2 = vunpack.c.l.bf16 %v235_v0  ;;  %v240_v3 = vunpack.c.l.bf16 %v242_v1  ;;  %v237_v4 = vunpack.c.h.bf16 %v235_v0  ;;  %v241_v5 = vunpack.c.h.bf16 %v242_v1  ;;  %v255_v30 = vld [vmem:[%s341_s3] sm:$0xff]   ;;  %v256_v31 = vld [vmem:[%s341_s3 + $0x8] sm:$0xff]  }
   0x3   :  { %247 = vmatprep.subr.bf16.mxu0 %v255_v30  ;;  %v219_v46 = vld [vmem:[%s342_s1] ss:$0 sm:$0xff] }
   0x4   :  { %v34_v6 = vsel %vm33_vm0, %v236_v2, 0.0  ;;  %v40_v7 = vsel %vm33_vm0, %v240_v3, 0.0  ;;  %v37_v8 = vsel %vm33_vm0, %v237_v4, 0.0  ;;  %v43_v9 = vsel %vm33_vm0, %v241_v5, 0.0  ;;  %248 = vmatpush3.bf16.msra.mxu0 %v255_v30  ;;  %v220_v51 = vld [vmem:[%s343_s2] ss:$0 sm:$0xff] }
   0x5   :  { %35 = vadd.xlane.f32.xlu0 %v34_v6  ;;  %41 = vadd.xlane.f32.xlu1 %v40_v7 }
   0x6   :  { %249 = vmatprep.subr.bf16.mxu0 %v256_v31 }
   0x8   :  { %250 = vmatpush3.bf16.msra.mxu0 %v256_v31 }
   0x9   :  { %38 = vadd.xlane.f32.xlu0 %v37_v8  ;;  %44 = vadd.xlane.f32.xlu1 %v43_v9 }
  0x92   :  { %v36_v10 = vpop.xlane.xlu0 %35  ;;  %v42_v11 = vpop.xlane.xlu1 %41 }
  0x93   :  { %v47_v12 = vmul.f32 0.03125, %v36_v10  ;;  %v49_v13 = vmul.f32 0.03125, %v42_v11 }
  0x95   :  { %v51_v14 = vsub.f32 %v236_v2, %v47_v12  ;;  %v53_v15 = vsub.f32 %v240_v3, %v49_v13  ;;  %v221_v2 = vld [vmem:[%s344_s4] ss:$0 sm:$0xff] }
  0x96   :  { %v39_v16 = vpop.xlane.xlu0 %38  ;;  %v45_v17 = vpop.xlane.xlu1 %44 }
  0x97   :  { %v48_v18 = vmul.f32 0.03125, %v39_v16  ;;  %v50_v19 = vmul.f32 0.03125, %v45_v17  ;;  %v55_v20 = vmul.f32 %v51_v14, %v51_v14  ;;  %v57_v21 = vmul.f32 %v53_v15, %v53_v15 }
  0x99   :  { %v52_v22 = vsub.f32 %v237_v4, %v48_v18  ;;  %v54_v23 = vsub.f32 %v241_v5, %v50_v19  ;;  %v59_v24 = vsel %vm33_vm0, %v55_v20, 0.0  ;;  %v65_v25 = vsel %vm33_vm0, %v57_v21, 0.0 }
  0x9a   :  { %60 = vadd.xlane.f32.xlu0 %v59_v24 }
  0x9b   :  { %v56_v26 = vmul.f32 %v52_v22, %v52_v22  ;;  %v58_v27 = vmul.f32 %v54_v23, %v54_v23 }
  0x9d   :  { %v62_v28 = vsel %vm33_vm0, %v56_v26, 0.0  ;;  %v68_v29 = vsel %vm33_vm0, %v58_v27, 0.0 }
  0x9e   :  { %66 = vadd.xlane.f32.xlu0 %v65_v25  ;;  %63 = vadd.xlane.f32.xlu1 %v62_v28 }
  0xa2   :  { %69 = vadd.xlane.f32.xlu1 %v68_v29 }
 0x127   :  { %v61_v32 = vpop.xlane.xlu0 %60 }
 0x128   :  { %v71_v33 = vmul.f32 0.03125, %v61_v32 }
 0x12a   :  { %v75_v34 = vadd.f32 1e-06, %v71_v33 }
 0x12b   :  { %v64_v35 = vpop.xlane.xlu1 %63  ;;  %v67_v36 = vpop.xlane.xlu0 %66 }
 0x12c   :  { %257 = vrsqrt.f32 %v75_v34  ;;  %v72_v37 = vmul.f32 0.03125, %v64_v35  ;;  %v73_v38 = vmul.f32 0.03125, %v67_v36 }
 0x12e   :  { %v76_v39 = vadd.f32 1e-06, %v72_v37  ;;  %v77_v40 = vadd.f32 1e-06, %v73_v38 }
 0x12f   :  { %v70_v41 = vpop.xlane.xlu1 %69 }
 0x130   :  { %259 = vrsqrt.f32 %v76_v39  ;;  %v74_v42 = vmul.f32 0.03125, %v70_v41 }
 0x131   :  { %261 = vrsqrt.f32 %v77_v40 }
 0x132   :  { %v78_v43 = vadd.f32 1e-06, %v74_v42 }
 0x134   :  { %263 = vrsqrt.f32 %v78_v43 }
 0x136   :  { %v258_v44 = vpop.eup %257 }
 0x137   :  { %v83_v45 = vmul.f32 %v258_v44, %v51_v14 }
 0x139   :  { %v94_v49 = vmul.f32 %v219_v46, %v83_v45 }
 0x13a   :  { %v260_v47 = vpop.eup %259 }
 0x13b   :  { %v262_v48 = vpop.eup %261  ;;  %v84_v50 = vmul.f32 %v260_v47, %v52_v22  ;;  %v105_v55 = vadd.f32 %v220_v51, %v94_v49 }
 0x13c   :  { %v85_v52 = vmul.f32 %v262_v48, %v53_v15 }
 0x13d   :  { %v95_v53 = vmul.f32 %v219_v46, %v84_v50 }
 0x13e   :  { %v264_v54 = vpop.eup %263  ;;  %v96_v57 = vmul.f32 %v219_v46, %v85_v52 }
 0x13f   :  { %v106_v56 = vadd.f32 %v220_v51, %v95_v53  ;;  %v86_v58 = vmul.f32 %v264_v54, %v54_v23 }
 0x140   :  { %v107_v61 = vadd.f32 %v220_v51, %v96_v57 }
 0x141   :  { %v109_v59 = vpack.c.bf16 %v106_v56, %v105_v55  ;;  %v97_v60 = vmul.f32 %v219_v46, %v86_v58 }
 0x143   :  { %111 = vst.msk [vmem:[#allocation2] sm:$0xff] %vm33_vm0, %v109_v59  ;;  %v108_v62 = vadd.f32 %v220_v51, %v97_v60 }
 0x145   :  { %v110_v63 = vpack.c.bf16 %v108_v62, %v107_v61 }
 0x147   :  { %112 = vst.msk [vmem:[#allocation2 + $0x8] sm:$0xff] %vm33_vm0, %v110_v63 }
 0x14a   :  { %v113_v0 = vld [vmem:[#allocation2] sm:$0xff] }
 0x14b   :  { %251 = vmatprep.mubr.msk.bf16.mxu0 %vm33_vm0, %v113_v0 }
 0x14e   :  { %v114_v1 = vld [vmem:[#allocation2 + $0x8] sm:$0xff] }
 0x14f   :  { %252 = vmatmul.mubr.msk.bf16.vlgmr.msra.gmra.mrb[0].mxu0 %vm33_vm0, %v114_v1 }
 0x222   :  { %v253_v3 = vpop.f32.mrb[0].mxu0 }
 0x223   :  { %v188_v4 = vadd.f32 %v253_v3, %v221_v2  ;;  %v179_v5 = vpop.f32.mrb[1].mxu0 }
 0x224   :  { %v180_v6 = vadd.f32 %v221_v2, %v179_v5  ;;  %v254_v7 = vpop.f32.mrb[2].mxu0 }
 0x225   :  { %v232_v8 = vpack.c.bf16 %v188_v4, %v188_v4  ;;  %v191_v9 = vadd.f32 %v254_v7, %v221_v2  ;;  %v182_v10 = vpop.f32.mrb[3].mxu0 }
 0x226   :  { %v230_v11 = vpack.c.bf16 %v180_v6, %v180_v6  ;;  %v183_v12 = vadd.f32 %v221_v2, %v182_v10 }
 0x227   :  { %213 = vst.msk [vmem:[%s345_s5 + $0x8] sm:$0xf] %vm210_vm1, %v232_v8  ;;  %v233_v13 = vpack.c.bf16 %v191_v9, %v191_v9 }
 0x228   :  { %211 = vst.msk [vmem:[%s345_s5] sm:$0xf] %vm210_vm1, %v230_v11  ;;  %v231_v14 = vpack.c.bf16 %v183_v12, %v183_v12 }
 0x229   :  { %214 = vst.msk [vmem:[%s345_s5 + $0xc] sm:$0xf] %vm210_vm1, %v233_v13 }
 0x22a   :  { %212 = vst.msk [vmem:[%s345_s5 + $0x4] sm:$0xf] %vm210_vm1, %v231_v14 }

// kernel: idefics3_vision_transformer.12
= control target key start
LH: loop header
LB: loop body
LE: loop exit
PB: predicated region body
PF: predicated region fallthrough
CT: control target
= control target key end

     0   :  { %s432_s15 = smov 0   ;;  %s467_s0 = inlined_call_operand.vmem [shape: f32[2,16,48], index: 0, kind: input, shape index: {}]   ;;  %s468_s1 = inlined_call_operand.vmem [shape: bf16[48,32], index: 1, kind: input, shape index: {}]   ;;  %s469_s2 = inlined_call_operand.vmem [shape: f32[1,32], index: 2, kind: input, shape index: {}]   ;;  %s470_s3 = inlined_call_operand.vmem [shape: f32[16,32], index: 3, kind: input, shape index: {}]   ;;  %s471_s4 = inlined_call_operand.vmem [shape: bf16[2,16,32], index: 4, kind: output, shape index: {}]  }
   0x1 LB: > { %s348_s16 = sadd.s32 4294967295, %s403_s15   ;;  %p352_p0 = scmp.ge.s32.totalorder %s403_s15, 1  ;;  %s403_s15 = sphi %s432_s15, %s14_s15  }
   0x2   : > { %p162_p1 = scmp.lt.s32.totalorder %s403_s15, 3 }
   0x4   : > { %p163_p2 = pnand %p352_p0, %p162_p1 }
   0x5   : > { %v394_v0 = vld [vmem:[%s468_s1] sm:$0xff] (!%p163_p2)   ;;  %v405_v1 = vmov (!%p163_p2), 0.0   ;;  %v395_v2 = vld [vmem:[%s468_s1 + $0x8] sm:$0xff] (!%p163_p2)   ;;  %vm406_vm0 = vmmov (!%p163_p2), 0   ;;  %p188_p3 = scmp.lt.s32.totalorder (!%p163_p2), %s348_s16, 1  ;;  %v396_v3 = vld [vmem:[%s468_s1 + $0x10] sm:$0xff] (!%p163_p2)  }
   0x6   : > { %166 = sbr.rel (%p163_p2) target bundleno = 240 (0xf0), region = 36  ;;  %374 = vmatprep.subr.bf16.mxu0 (!%p163_p2), %v405_v1  ;;  %380 = vmatprep.mubr.msk.bf16.mxu0 (!%p163_p2), %vm406_vm0, %v405_v1  ;;  %vm233_vm1 = vcmask (!%p163_p2), 392192   ;;  %v357_v7 = vld [vmem:[%s469_s2] ss:$0 sm:$0xff] (!%p163_p2)  ;;  %v279_v13 = vld [vmem:[%s470_s3 + $0x8] sm:$0xff] (!%p163_p2)  ;;  %vm290_vm2 = vcmask (!%p163_p2), 257024  }
   0x7   : > { %375 = vmatpush3.bf16.msra.mxu0 (!%p163_p2), %v394_v0  ;;  %v278_v9 = vld [vmem:[%s470_s3] sm:$0xff] (!%p163_p2) }
   0x8   : > { %376 = vmatprep.subr.bf16.mxu0 (!%p163_p2), %v405_v1 }
   0xb   : > { %377 = vmatpush3.bf16.msra.mxu0 (!%p163_p2), %v395_v2 }
   0xc   : > { %378 = vmatprep.subr.bf16.mxu0 (!%p163_p2), %v405_v1 }
   0xd   : > { %s473_s16 = smov (!%p188_p3, %s348_s16), 1 }
   0xe   : > { %s366_s23 = sshll.u32 %s473_s16, 4  ;;  %s367_s5 = sshll.u32 %s473_s16, 3 }
   0xf   : > { %s192_s26 = scalar_lea.vmem %s467_s0, %s366_s23  ;;  %379 = vmatpush3.bf16.msra.mxu0 %v396_v3  ;;  %s197_s10 = scalar_lea.vmem %s471_s4, %s367_s5 }
  0x10   : > { %v199_v4 = vld [vmem:[%s192_s26] sm:$0xff]  ;;  %v200_v5 = vld [vmem:[%s192_s26 + $0x8] sm:$0xff] }
  0x11   : > { %v201_v6 = vpack.c.bf16 %v200_v5, %v199_v4 }
  0x13   : > { %381 = vmatmul.mubr.msk.bf16.vlgmr.msra.gmra.mrb[0].mxu0 %vm233_vm1, %v201_v6 }
  0xe6   : > { %v271_v8 = vpop.f32.mrb[0].mxu0 }
  0xe7   : > { %v272_v10 = vadd.f32 %v357_v7, %v271_v8  ;;  %v382_v11 = vpop.f32.mrb[1].mxu0 }
  0xe8   : > { %v274_v12 = vpop.f32.mrb[2].mxu0 }
  0xe9   : > { %v280_v14 = vadd.f32 %v278_v9, %v272_v10  ;;  %v275_v15 = vadd.f32 %v357_v7, %v274_v12  ;;  %v383_v16 = vpop.f32.mrb[3].mxu0 }
  0xeb   : > { %v368_v17 = vpack.c.bf16 %v280_v14, %v280_v14  ;;  %v281_v18 = vadd.f32 %v279_v13, %v275_v15 }
  0xed   : > { %291 = vst.msk [vmem:[%s197_s10] sm:$0xf] %vm290_vm2, %v368_v17  ;;  %v369_v19 = vpack.c.bf16 %v281_v18, %v281_v18 }
  0xef   : > { %292 = vst.msk [vmem:[%s197_s10 + $0x4] sm:$0xf] %vm290_vm2, %v369_v19 }
  0xf0 PF: > { %s14_s15 = sadd.s32 1, %s403_s15  }
  0xf1   : > { %p11_p4 = scmp.ge.s32.totalorder %s14_s15, 4  }
  0xf3   :  { %13 = sbr.rel (!%p11_p4) target bundleno = 1 (0x1), region = 66 }

// kernel: idefics3_vision_transformer.14
= control target key start
LH: loop header
LB: loop body
LE: loop exit
PB: predicated region body
PF: predicated region fallthrough
CT: control target
= control target key end

     0   :  { %s634_s6 = smov 0   ;;  %s636_s7 = smov 0   ;;  %s730_s0 = inlined_call_operand.vmem [shape: bf16[3,2,4,16,8], index: 0, kind: input, shape index: {}]   ;;  %s731_s1 = inlined_call_operand.vmem [shape: bf16[2,4,16,8], index: 1, kind: output, shape index: {}]  }
   0x1   :  { %s638_s8 = smov 0   ;;  %s640_s9 = smov 0  }
   0x2   :  { %s642_s10 = smov 0   ;;  %s644_s11 = smov 0  }
   0x3   :  { %s646_s12 = smov 0  }
   0x4 LB: > { %s20_s13 = sadd.s32 1, %s612_s10  ;;  %s23_s14 = sadd.s32 1, %s616_s11  ;;  %s620_s12 = sphi %s646_s12, %s11_s12   ;;  %s616_s11 = sphi %s644_s11, %s737_s11   ;;  %s612_s10 = sphi %s642_s10, %s736_s10   ;;  %s608_s9 = sphi %s640_s9, %s735_s9   ;;  %s604_s8 = sphi %s638_s8, %s734_s8   ;;  %s600_s7 = sphi %s636_s7, %s733_s7   ;;  %s596_s6 = sphi %s634_s6, %s732_s6  }
   0x5   : > { %p21_p0 = scmp.ge.s32.totalorder %s20_s13, 4  ;;  %p39_p1 = scmp.ne.s32.totalorder %s600_s7, %s596_s6 }
   0x6   : > { %p40_p2 = scmp.eq.s32.totalorder %s620_s12, 0  ;;  %s32_s18 = sadd.s32 1, %s600_s7 }
   0x7   : > { %s739_s13 = smov (%p21_p0, %s20_s13), 0  ;;  %s741_s14 = smov (!%p21_p0, %s23_s14), %s616_s11 }
   0x8   : > { %p41_p3 = por %p40_p2, %p39_p1  ;;  %p25_p4 = scmp.ge.s32.totalorder %s741_s14, 2 }
   0x9   : > { %s28_s15 = ssub.s32 %s612_s10, %s739_s13  ;;  %p458_p6 = scmp.ge.s32.totalorder %s620_s12, 8 }
   0xa   : > { %s743_s14 = smov (%p25_p4, %s741_s14), 0 }
   0xb   : > { %s27_s16 = ssub.s32 %s616_s11, %s743_s14  ;;  %93 = sbr.rel (%p458_p6) target bundleno = 28 (0x1c), region = 16 }
   0xc   : > { %s29_s17 = sor.u32 %s28_s15, %s27_s16 }
   0xd   : > { %p30_p5 = scmp.eq.s32.totalorder %s29_s17, 0 }
   0xf   : > { %s685_s19 = scalar_select %p30_p5, %s600_s7, %s32_s18  }
  0x12   : > { %96 = sbr.rel (!%p41_p3) target bundleno = 28 (0x1c), region = 20  ;;  %s98_s20 = sand.u32 (%p41_p3), 1, %s600_s7  }
  0x13   : > { %s459_s21 = sshll.u32 (%p41_p3), %s612_s10, 1  ;;  %s497_s22 = smul.u32 (%p41_p3), 24, %s98_s20 }
  0x14   : > { %s460_s23 = sshll.u32 (%p41_p3), %s616_s11, 3 }
  0x15   : > { %s103_s24 = sadd.s32 (%p41_p3), %s460_s23, %s459_s21  ;;  %s100_s29 = scalar_lea.vmem (%p41_p3), [#allocation2], %s497_s22 }
  0x16   : > { %s461_s25 = sshll.u32 (%p41_p3), %s103_s24, 2 }
  0x17   : > { %s105_s28 = scalar_lea.vmem (%p41_p3), %s730_s0, %s461_s25 }
  0x18   : > { %v121_v0 = vld [vmem:[%s105_s28] sm:$0xff] (%p41_p3)  }
  0x19   : > { %v125_v1 = vld [vmem:[%s105_s28 + $0x40] sm:$0xff]   ;;  %122 = vst [vmem:[%s100_s29] sm:$0xff] %v121_v0  }
  0x1a   : > { %v129_v2 = vld [vmem:[%s105_s28 + $0x80] sm:$0xff]   ;;  %126 = vst [vmem:[%s100_s29 + $0x8] sm:$0xff] %v125_v1  }
  0x1b   : > { %130 = vst [vmem:[%s100_s29 + $0x10] sm:$0xff] %v129_v2  }
  0x1c PF: > { %p462_p7 = scmp.ge.s32.totalorder %s620_s12, 1  ;;  %p166_p8 = scmp.lt.s32.totalorder %s620_s12, 9 }
  0x1e   : > { %p167_p9 = pnand %p462_p7, %p166_p8 }
  0x1f   : > { %s173_s30 = sand.u32 (!%p167_p9), 1, %s596_s6   ;;  %v622_v3 = vmov (!%p167_p9), 0.0   ;;  %vm623_vm0 = vmmov (!%p167_p9), 0   ;;  %vm224_vm1 = vcmask (!%p167_p9), 64512   ;;  %vm274_vm2 = vcmask (!%p167_p9), 130048   ;;  %p196_p10 = scmp.lt.s32.totalorder (!%p167_p9), %s608_s9, 1 }
  0x20   : > { %170 = sbr.rel (%p167_p9) target bundleno = 643 (0x283), region = 61  ;;  %485 = vmatprep.subr.bf16.mxu0 (!%p167_p9), %v622_v3  ;;  %487 = vmatprep.mubr.msk.bf16.mxu0 (!%p167_p9), %vm623_vm0, %v622_v3  ;;  %p198_p11 = scmp.lt.s32.totalorder (!%p167_p9), %s604_s8, 3  ;;  %vm357_vm3 = vcmask (!%p167_p9), 60416  }
  0x21   : > { %s498_s2 = smul.u32 (!%p167_p9), 24, %s173_s30  ;;  %491 = vmatprep.subr.bf16.mxu1 (!%p167_p9), %v622_v3  ;;  %493 = vmatprep.mubr.msk.bf16.mxu1 (!%p167_p9), %vm623_vm0, %v622_v3 }
  0x23   : > { %s175_s3 = scalar_lea.vmem (!%p167_p9), [#allocation2], %s498_s2 }
  0x24   : > { %v557_v4 = vld [vmem:[%s175_s3 + $0x8] sm:$0xff] (!%p167_p9)   ;;  %v558_v6 = vld [vmem:[%s175_s3] sm:$0xff] (!%p167_p9)   ;;  %v559_v15 = vld [vmem:[%s175_s3 + $0x10] sm:$0xff] (!%p167_p9)  }
  0x25   : > { %v229_v5 = vsel (!%p167_p9), %vm224_vm1, %v557_v4, 0  ;;  %492 = vmatpush3.bf16.msra.mxu1 (!%p167_p9), %v559_v15 }
  0x26   : > { %486 = vmatpush3.bf16.xpose.msra.mxu0 (!%p167_p9), %v229_v5 }
  0x27   : > { %s745_s9 = smov (!%p196_p10, %s608_s9), 1  ;;  %s747_s8 = smov (!%p198_p11, %s604_s8), 3 }
  0x28   : > { %s463_s4 = sshll.u32 %s747_s8, 1  ;;  %s464_s5 = sshll.u32 %s745_s9, 3 }
  0x29   : > { %s202_s6 = sadd.s32 %s464_s5, %s463_s4 }
  0x2a   : > { %s465_s15 = sshll.u32 %s202_s6, 2 }
  0x2b   : > { %s204_s18 = scalar_lea.vmem %s731_s1, %s465_s15 }
  0x2d   : > { %488 = vmatmul.mubr.msk.bf16.vlgmr.msra.gmra.mrb[0].mxu0 %vm224_vm1, %v558_v6 }
 0x100   : > { %v265_v7 = vpop.f32.mrb[0].mxu0 }
 0x101   : > { %v272_v8 = vmul.f32 0.35355338, %v265_v7  ;;  %v489_v9 = vpop.f32.mrb[1].mxu0 }
 0x102   : > { %v268_v10 = vpop.f32.mrb[2].mxu0 }
 0x103   : > { %v273_v11 = vmul.f32 0.35355338, %v268_v10  ;;  %v490_v12 = vpop.f32.mrb[3].mxu0  ;;  %v275_v13 = vsel %vm274_vm2, %v272_v8, -inf }
 0x104   : > { %276 = vmax.xlane.f32.xlu0 %v275_v13 }
 0x105   : > { %v278_v14 = vsel %vm274_vm2, %v273_v11, -inf }
 0x108   : > { %279 = vmax.xlane.f32.xlu0 %v278_v14 }
 0x191   : > { %v277_v16 = vpop.xlane.xlu0 %276 }
 0x192   : > { %v281_v18 = vsub.f32 %v272_v8, %v277_v16 }
 0x195   : > { %v280_v17 = vpop.xlane.xlu0 %279 }
 0x196   : > { %v282_v19 = vsub.f32 %v273_v11, %v280_v17 }
 0x198   : > { %v283_v20 = vpack.c.bf16 %v282_v19, %v281_v18 }
 0x19a   : > { %v285_v21 = vmul.bf16 1069105081, %v283_v20 }
 0x19c   : > { %560 = vpow.bf16 %v285_v21 }
 0x1a7   : > { %v561_v22 = vpop.eup %560 }
 0x1a8   : > { %494 = vmatmul.mubr.msk.bf16.vlgmr.msra.gmra.mrb[0].mxu1 %vm274_vm2, %v561_v22  ;;  %v287_v23 = vunpack.c.l.bf16 %v561_v22  ;;  %v288_v25 = vunpack.c.h.bf16 %v561_v22 }
 0x1aa   : > { %v289_v24 = vsel %vm274_vm2, %v287_v23, 0.0  ;;  %v292_v26 = vsel %vm274_vm2, %v288_v25, 0.0 }
 0x1ab   : > { %290 = vadd.xlane.f32.xlu1 %v289_v24 }
 0x1af   : > { %293 = vadd.xlane.f32.xlu1 %v292_v26 }
 0x238   : > { %v291_v27 = vpop.xlane.xlu1 %290 }
 0x239   : > { %562 = vrcp.f32 %v291_v27 }
 0x23c   : > { %v294_v28 = vpop.xlane.xlu1 %293 }
 0x23d   : > { %564 = vrcp.f32 %v294_v28 }
 0x243   : > { %v563_v29 = vpop.eup %562 }
 0x247   : > { %v565_v33 = vpop.eup %564 }
 0x27b   : > { %v338_v30 = vpop.f32.mrb[0].mxu1 }
 0x27c   : > { %v347_v31 = vmul.f32 %v563_v29, %v338_v30  ;;  %v495_v32 = vpop.f32.mrb[1].mxu1 }
 0x27d   : > { %v341_v34 = vpop.f32.mrb[2].mxu1 }
 0x27e   : > { %v479_v35 = vpack.c.bf16 %v347_v31, %v347_v31  ;;  %v348_v36 = vmul.f32 %v565_v33, %v341_v34  ;;  %v496_v37 = vpop.f32.mrb[3].mxu1 }
 0x280   : > { %358 = vst.msk [vmem:[%s204_s18] sm:$0xf] %vm357_vm3, %v479_v35  ;;  %v480_v38 = vpack.c.bf16 %v348_v36, %v348_v36 }
 0x282   : > { %359 = vst.msk [vmem:[%s204_s18 + $0x4] sm:$0xf] %vm357_vm3, %v480_v38 }
 0x283 PF: > { %s11_s12 = sadd.s32 1, %s620_s12   ;;  %s732_s6 = smov %s600_s7 }
 0x284   : > { %p8_p12 = scmp.ge.s32.totalorder %s11_s12, 10   ;;  %s733_s7 = smov %s685_s19 }
 0x285   : > { %s734_s8 = smov %s612_s10  ;;  %s735_s9 = smov %s616_s11 }
 0x286   : > { %s736_s10 = smov %s739_s13  ;;  %s737_s11 = smov %s743_s14 }
 0x287   :  { %10 = sbr.rel (!%p8_p12) target bundleno = 4 (0x4), region = 102 }

// kernel: idefics3_vision_transformer.15
= control target key start
LH: loop header
LB: loop body
LE: loop exit
PB: predicated region body
PF: predicated region fallthrough
CT: control target
= control target key end

     0   :  { %vm55_vm0 = vcmask 261120   ;;  %vm139_vm1 = vcmask 257024   ;;  %s246_s1 = inlined_call_operand.vmem [shape: bf16[32,32], index: 1, kind: input, shape index: {}]   ;;  %s247_s0 = inlined_call_operand.vmem [shape: bf16[32,32], index: 0, kind: input, shape index: {}]   ;;  %s248_s3 = inlined_call_operand.vmem [shape: bf16[32,32], index: 3, kind: input, shape index: {}]   ;;  %s249_s2 = inlined_call_operand.vmem [shape: f32[1,32], index: 2, kind: input, shape index: {}]   ;;  %s250_s4 = inlined_call_operand.vmem [shape: bf16[32,32], index: 4, kind: output, shape index: {}]  }
   0x1   :  { %v184_v0 = vld [vmem:[%s246_s1] sm:$0xff]   ;;  %v185_v1 = vld [vmem:[%s246_s1 + $0x8] sm:$0xff]  }
   0x2   :  { %176 = vmatprep.subr.bf16.mxu0 %v184_v0  ;;  %v186_v2 = vld [vmem:[%s247_s0] sm:$0xff]   ;;  %v187_v3 = vld [vmem:[%s247_s0 + $0x8] sm:$0xff]  }
   0x3   :  { %177 = vmatpush3.bf16.msra.mxu0 %v184_v0  ;;  %180 = vmatprep.mubr.msk.bf16.mxu0 %vm55_vm0, %v186_v2  ;;  %v171_v4 = vld [vmem:[%s248_s3 + $0x8] sm:$0xff]   ;;  %v164_v5 = vld [vmem:[%s248_s3] sm:$0xff]  }
   0x4   :  { %178 = vmatprep.subr.bf16.mxu0 %v185_v1  ;;  %v148_v6 = vld [vmem:[%s249_s2] ss:$0 sm:$0xff]  ;;  %v169_v7 = vunpack.c.l.bf16 %v171_v4  ;;  %v165_v9 = vunpack.c.l.bf16 %v164_v5  ;;  %v170_v12 = vunpack.c.h.bf16 %v171_v4  ;;  %v166_v15 = vunpack.c.h.bf16 %v164_v5 }
   0x7   :  { %179 = vmatpush3.bf16.msra.mxu0 %v185_v1 }
   0xa   :  { %181 = vmatmul.mubr.msk.bf16.vlgmr.msra.gmra.mrb[0].mxu0 %vm55_vm0, %v187_v3 }
  0xdd   :  { %v182_v8 = vpop.f32.mrb[0].mxu0 }
  0xde   :  { %v105_v10 = vadd.f32 %v182_v8, %v148_v6  ;;  %v96_v11 = vpop.f32.mrb[1].mxu0 }
  0xdf   :  { %v97_v13 = vadd.f32 %v148_v6, %v96_v11  ;;  %v183_v14 = vpop.f32.mrb[2].mxu0 }
  0xe0   :  { %v121_v16 = vadd.f32 %v169_v7, %v105_v10  ;;  %v108_v17 = vadd.f32 %v183_v14, %v148_v6  ;;  %v99_v18 = vpop.f32.mrb[3].mxu0 }
  0xe1   :  { %v119_v19 = vadd.f32 %v165_v9, %v97_v13  ;;  %v100_v20 = vadd.f32 %v148_v6, %v99_v18 }
  0xe2   :  { %v161_v21 = vpack.c.bf16 %v121_v16, %v121_v16  ;;  %v122_v22 = vadd.f32 %v170_v12, %v108_v17 }
  0xe3   :  { %v159_v23 = vpack.c.bf16 %v119_v19, %v119_v19  ;;  %v120_v24 = vadd.f32 %v166_v15, %v100_v20 }
  0xe4   :  { %142 = vst.msk [vmem:[%s250_s4 + $0x8] sm:$0xf] %vm139_vm1, %v161_v21  ;;  %v162_v25 = vpack.c.bf16 %v122_v22, %v122_v22 }
  0xe5   :  { %140 = vst.msk [vmem:[%s250_s4] sm:$0xf] %vm139_vm1, %v159_v23  ;;  %v160_v26 = vpack.c.bf16 %v120_v24, %v120_v24 }
  0xe6   :  { %143 = vst.msk [vmem:[%s250_s4 + $0xc] sm:$0xf] %vm139_vm1, %v162_v25 }
  0xe7   :  { %141 = vst.msk [vmem:[%s250_s4 + $0x4] sm:$0xf] %vm139_vm1, %v160_v26 }

// kernel: idefics3_vision_transformer.17
= control target key start
LH: loop header
LB: loop body
LE: loop exit
PB: predicated region body
PF: predicated region fallthrough
CT: control target
= control target key end

     0   :  { %vm71_vm0 = vcmask 523264   ;;  %vm155_vm1 = vcmask 257024   ;;  %s278_s1 = inlined_call_operand.vmem [shape: bf16[64,32], index: 1, kind: input, shape index: {}]   ;;  %s279_s0 = inlined_call_operand.vmem [shape: bf16[32,64], index: 0, kind: input, shape index: {}]   ;;  %s280_s3 = inlined_call_operand.vmem [shape: bf16[32,32], index: 3, kind: input, shape index: {}]   ;;  %s281_s2 = inlined_call_operand.vmem [shape: f32[1,32], index: 2, kind: input, shape index: {}]   ;;  %s282_s4 = inlined_call_operand.vmem [shape: bf16[32,32], index: 4, kind: output, shape index: {}]  }
   0x1   :  { %v208_v0 = vld [vmem:[%s278_s1] sm:$0xff]   ;;  %v209_v1 = vld [vmem:[%s278_s1 + $0x8] sm:$0xff]   ;;  %v210_v2 = vld [vmem:[%s278_s1 + $0x10] sm:$0xff]  }
   0x2   :  { %196 = vmatprep.subr.bf16.mxu0 %v208_v0  ;;  %v212_v3 = vld [vmem:[%s279_s0] sm:$0xff]   ;;  %v211_v4 = vld [vmem:[%s278_s1 + $0x18] sm:$0xff]   ;;  %v213_v5 = vld [vmem:[%s279_s0 + $0x8] sm:$0xff]  }
   0x3   :  { %197 = vmatpush3.bf16.msra.mxu0 %v208_v0  ;;  %204 = vmatprep.mubr.msk.bf16.mxu0 %vm71_vm0, %v212_v3  ;;  %v189_v6 = vld [vmem:[%s280_s3 + $0x8] sm:$0xff]   ;;  %v182_v7 = vld [vmem:[%s280_s3] sm:$0xff]  }
   0x4   :  { %198 = vmatprep.subr.bf16.mxu0 %v209_v1  ;;  %v164_v8 = vld [vmem:[%s281_s2] ss:$0 sm:$0xff]  ;;  %v187_v9 = vunpack.c.l.bf16 %v189_v6  ;;  %v183_v11 = vunpack.c.l.bf16 %v182_v7  ;;  %v188_v14 = vunpack.c.h.bf16 %v189_v6  ;;  %v184_v17 = vunpack.c.h.bf16 %v182_v7 }
   0x7   :  { %199 = vmatpush3.bf16.msra.mxu0 %v209_v1 }
   0x8   :  { %200 = vmatprep.subr.bf16.mxu0 %v210_v2 }
   0xb   :  { %201 = vmatpush3.bf16.msra.mxu0 %v210_v2 }
   0xc   :  { %202 = vmatprep.subr.bf16.mxu0 %v211_v4 }
   0xf   :  { %203 = vmatpush3.bf16.msra.mxu0 %v211_v4 }
  0x12   :  { %205 = vmatmul.mubr.msk.bf16.vlgmr.msra.gmra.mrb[0].mxu0 %vm71_vm0, %v213_v5 }
  0xe5   :  { %v206_v10 = vpop.f32.mrb[0].mxu0 }
  0xe6   :  { %v121_v12 = vadd.f32 %v206_v10, %v164_v8  ;;  %v112_v13 = vpop.f32.mrb[1].mxu0 }
  0xe7   :  { %v113_v15 = vadd.f32 %v164_v8, %v112_v13  ;;  %v207_v16 = vpop.f32.mrb[2].mxu0 }
  0xe8   :  { %v137_v18 = vadd.f32 %v187_v9, %v121_v12  ;;  %v124_v19 = vadd.f32 %v207_v16, %v164_v8  ;;  %v115_v20 = vpop.f32.mrb[3].mxu0 }
  0xe9   :  { %v135_v21 = vadd.f32 %v183_v11, %v113_v15  ;;  %v116_v22 = vadd.f32 %v164_v8, %v115_v20 }
  0xea   :  { %v179_v23 = vpack.c.bf16 %v137_v18, %v137_v18  ;;  %v138_v24 = vadd.f32 %v188_v14, %v124_v19 }
  0xeb   :  { %v177_v25 = vpack.c.bf16 %v135_v21, %v135_v21  ;;  %v136_v26 = vadd.f32 %v184_v17, %v116_v22 }
  0xec   :  { %158 = vst.msk [vmem:[%s282_s4 + $0x8] sm:$0xf] %vm155_vm1, %v179_v23  ;;  %v180_v27 = vpack.c.bf16 %v138_v24, %v138_v24 }
  0xed   :  { %156 = vst.msk [vmem:[%s282_s4] sm:$0xf] %vm155_vm1, %v177_v25  ;;  %v178_v28 = vpack.c.bf16 %v136_v26, %v136_v26 }
  0xee   :  { %159 = vst.msk [vmem:[%s282_s4 + $0xc] sm:$0xf] %vm155_vm1, %v180_v27 }
  0xef   :  { %157 = vst.msk [vmem:[%s282_s4 + $0x4] sm:$0xf] %vm155_vm1, %v178_v28 }

// kernel: idefics3_vision_transformer.23
= control target key start
LH: loop header
LB: loop body
LE: loop exit
PB: predicated region body
PF: predicated region fallthrough
CT: control target
= control target key end

     0   :  { %vm23_vm0 = vcmask 261120   ;;  %s224_s0 = inlined_call_operand.vmem [shape: bf16[32,32], index: 0, kind: input, shape index: {}]   ;;  %s225_s1 = inlined_call_operand.vmem [shape: f32[1,32], index: 1, kind: input, shape index: {}]   ;;  %s226_s2 = inlined_call_operand.vmem [shape: f32[1,32], index: 2, kind: input, shape index: {}]   ;;  %s227_s3 = inlined_call_operand.hbm [shape: f32[32,32], index: 3, kind: output, shape index: {}]  }
   0x1   :  { %v122_v0 = vld [vmem:[%s224_s0] sm:$0xff]   ;;  %v129_v1 = vld [vmem:[%s224_s0 + $0x8] sm:$0xff]  }
   0x2   :  { %8 = vsyncpa [#allocation3], 0  ;;  %v123_v2 = vunpack.c.l.bf16 %v122_v0  ;;  %v127_v3 = vunpack.c.l.bf16 %v129_v1  ;;  %v124_v4 = vunpack.c.h.bf16 %v122_v0  ;;  %v128_v5 = vunpack.c.h.bf16 %v129_v1  ;;  %v119_v43 = vld [vmem:[%s225_s1] ss:$0 sm:$0xff]  ;;  %s165_s1 = smov [#allocation2]  }
   0x3   :  { %v120_v45 = vld [vmem:[%s226_s2] ss:$0 sm:$0xff]  ;;  %s108_s19 = sshll.u32 %s165_s1, 4  ;;  %s109_s19 = int_to_ptr.vmem [resolvable:$true] %s108_s19 }
   0x4   :  { %v24_v6 = vsel %vm23_vm0, %v123_v2, 0.0  ;;  %v30_v7 = vsel %vm23_vm0, %v127_v3, 0.0  ;;  %v27_v8 = vsel %vm23_vm0, %v124_v4, 0.0  ;;  %v33_v9 = vsel %vm23_vm0, %v128_v5, 0.0  ;;  %s141_s2 = scalar_lea.vmem %s109_s19, 512  ;;  %p146_p1 = scmp.lt.s32.totalorder %s109_s19, %s109_s19 }
   0x5   :  { %25 = vadd.xlane.f32.xlu0 %v24_v6  ;;  %31 = vadd.xlane.f32.xlu1 %v30_v7  ;;  %p142_p0 = scmp.ne.s32.totalorder %s109_s19, %s141_s2  ;;  %p147_p2 = scmp.lt.s32.totalorder %s141_s2, %s141_s2 }
   0x7   :  { %p148_p3 = por %p147_p2, %p146_p1 }
   0x9   :  { %28 = vadd.xlane.f32.xlu0 %v27_v8  ;;  %34 = vadd.xlane.f32.xlu1 %v33_v9  ;;  %p149_p4 = pnand %p148_p3, %p142_p0 }
  0x92   :  { %v26_v10 = vpop.xlane.xlu0 %25  ;;  %v32_v11 = vpop.xlane.xlu1 %31 }
  0x93   :  { %v37_v12 = vmul.f32 0.03125, %v26_v10  ;;  %v39_v13 = vmul.f32 0.03125, %v32_v11 }
  0x95   :  { %v41_v14 = vsub.f32 %v123_v2, %v37_v12  ;;  %v43_v15 = vsub.f32 %v127_v3, %v39_v13 }
  0x96   :  { %v29_v16 = vpop.xlane.xlu0 %28  ;;  %v35_v17 = vpop.xlane.xlu1 %34 }
  0x97   :  { %v38_v18 = vmul.f32 0.03125, %v29_v16  ;;  %v40_v19 = vmul.f32 0.03125, %v35_v17  ;;  %v45_v20 = vmul.f32 %v41_v14, %v41_v14  ;;  %v47_v21 = vmul.f32 %v43_v15, %v43_v15 }
  0x99   :  { %v42_v22 = vsub.f32 %v124_v4, %v38_v18  ;;  %v44_v23 = vsub.f32 %v128_v5, %v40_v19  ;;  %v49_v24 = vsel %vm23_vm0, %v45_v20, 0.0  ;;  %v55_v25 = vsel %vm23_vm0, %v47_v21, 0.0 }
  0x9a   :  { %50 = vadd.xlane.f32.xlu0 %v49_v24 }
  0x9b   :  { %v46_v26 = vmul.f32 %v42_v22, %v42_v22  ;;  %v48_v27 = vmul.f32 %v44_v23, %v44_v23 }
  0x9d   :  { %v52_v28 = vsel %vm23_vm0, %v46_v26, 0.0  ;;  %v58_v29 = vsel %vm23_vm0, %v48_v27, 0.0 }
  0x9e   :  { %56 = vadd.xlane.f32.xlu0 %v55_v25  ;;  %53 = vadd.xlane.f32.xlu1 %v52_v28 }
  0xa2   :  { %59 = vadd.xlane.f32.xlu1 %v58_v29 }
 0x127   :  { %v51_v30 = vpop.xlane.xlu0 %50 }
 0x128   :  { %v61_v31 = vmul.f32 0.03125, %v51_v30 }
 0x12a   :  { %v65_v32 = vadd.f32 1e-06, %v61_v31 }
 0x12b   :  { %v54_v33 = vpop.xlane.xlu1 %53  ;;  %v57_v34 = vpop.xlane.xlu0 %56 }
 0x12c   :  { %133 = vrsqrt.f32 %v65_v32  ;;  %v62_v35 = vmul.f32 0.03125, %v54_v33  ;;  %v63_v36 = vmul.f32 0.03125, %v57_v34 }
 0x12e   :  { %v66_v37 = vadd.f32 1e-06, %v62_v35  ;;  %v67_v38 = vadd.f32 1e-06, %v63_v36 }
 0x12f   :  { %v60_v39 = vpop.xlane.xlu1 %59 }
 0x130   :  { %135 = vrsqrt.f32 %v66_v37  ;;  %v64_v40 = vmul.f32 0.03125, %v60_v39 }
 0x131   :  { %137 = vrsqrt.f32 %v67_v38 }
 0x132   :  { %v68_v41 = vadd.f32 1e-06, %v64_v40 }
 0x134   :  { %139 = vrsqrt.f32 %v68_v41 }
 0x136   :  { %v134_v42 = vpop.eup %133 }
 0x137   :  { %v73_v44 = vmul.f32 %v134_v42, %v41_v14 }
 0x139   :  { %v84_v46 = vmul.f32 %v119_v43, %v73_v44 }
 0x13a   :  { %v136_v47 = vpop.eup %135 }
 0x13b   :  { %v138_v48 = vpop.eup %137  ;;  %v95_v49 = vadd.f32 %v120_v45, %v84_v46  ;;  %v74_v50 = vmul.f32 %v136_v47, %v42_v22 }
 0x13c   :  { %v75_v51 = vmul.f32 %v138_v48, %v43_v15 }
 0x13d   :  { %99 = vst.msk [vmem:[#allocation2] sm:$0xff] %vm23_vm0, %v95_v49  ;;  %v85_v52 = vmul.f32 %v119_v43, %v74_v50 }
 0x13e   :  { %v140_v53 = vpop.eup %139  ;;  %v86_v54 = vmul.f32 %v119_v43, %v75_v51 }
 0x13f   :  { %v96_v55 = vadd.f32 %v120_v45, %v85_v52  ;;  %v76_v56 = vmul.f32 %v140_v53, %v44_v23 }
 0x140   :  { %v97_v57 = vadd.f32 %v120_v45, %v86_v54 }
 0x141   :  { %100 = vst.msk [vmem:[#allocation2 + $0x8] sm:$0xff] %vm23_vm0, %v96_v55  ;;  %v87_v58 = vmul.f32 %v119_v43, %v76_v56 }
 0x142   :  { %101 = vst.msk [vmem:[#allocation2 + $0x10] sm:$0xff] %vm23_vm0, %v97_v57 }
 0x143   :  { %v98_v59 = vadd.f32 %v120_v45, %v87_v58 }
 0x145   :  { %102 = vst.msk [vmem:[#allocation2 + $0x18] sm:$0xff] %vm23_vm0, %v98_v59 }
 0x146   :  { %152 = shalt.err (!%p149_p4)
}
 0x147   :  { %s153_s22 = scalar_lea.hbm %s227_s3, 512 }
 0x148   :  { %p154_p5 = scmp.ne.s32.totalorder %s227_s3, %s153_s22  ;;  %p157_p6 = scmp.lt.u32.totalorder %s153_s22, %s227_s3 }
 0x14a   :  { %p159_p7 = pnand %p157_p6, %p154_p5 }
 0x14c   :  { %162 = shalt.err (!%p159_p7)
}
 0x14d   :  { %s166_s27 = smov 128   ;;  %s167_s28 = smov 8  }
 0x14e   :  { %114 = dma.vmem_to_hbm [thread:$0]  %s109_s19, 512, %s227_s3, [#allocation3], %s166_s27, %s166_s27, %s167_s28  }
 0x14f   :  { %163 = dma.done.wait [#allocation3], 512  }
 0x150   :  { %164 = vsyncadd [#allocation3], 4294966784 }
 0x151   :  { %118 = vsyncpa [#allocation3], 1 }

// kernel: idefics3_vision_transformer.16
= control target key start
LH: loop header
LB: loop body
LE: loop exit
PB: predicated region body
PF: predicated region fallthrough
CT: control target
= control target key end

     0   :  { %vm33_vm0 = vcmask 261120   ;;  %vm246_vm1 = vcmask 519168   ;;  %s384_s0 = inlined_call_operand.vmem [shape: bf16[32,32], index: 0, kind: input, shape index: {}]   ;;  %s385_s3 = inlined_call_operand.vmem [shape: bf16[32,64], index: 3, kind: input, shape index: {}]   ;;  %s386_s1 = inlined_call_operand.vmem [shape: f32[1,32], index: 1, kind: input, shape index: {}]   ;;  %s387_s2 = inlined_call_operand.vmem [shape: f32[1,32], index: 2, kind: input, shape index: {}]   ;;  %s388_s4 = inlined_call_operand.vmem [shape: f32[1,64], index: 4, kind: input, shape index: {}]   ;;  %s389_s5 = inlined_call_operand.vmem [shape: bf16[32,64], index: 5, kind: output, shape index: {}]  }
   0x1   :  { %v271_v0 = vld [vmem:[%s384_s0] sm:$0xff]   ;;  %v278_v1 = vld [vmem:[%s384_s0 + $0x8] sm:$0xff]  }
   0x2   :  { %v272_v2 = vunpack.c.l.bf16 %v271_v0  ;;  %v276_v3 = vunpack.c.l.bf16 %v278_v1  ;;  %v273_v4 = vunpack.c.h.bf16 %v271_v0  ;;  %v277_v5 = vunpack.c.h.bf16 %v278_v1  ;;  %v291_v30 = vld [vmem:[%s385_s3] sm:$0xff]   ;;  %v292_v31 = vld [vmem:[%s385_s3 + $0x8] sm:$0xff]  }
   0x3   :  { %283 = vmatprep.subr.bf16.mxu0 %v291_v30  ;;  %v255_v46 = vld [vmem:[%s386_s1] ss:$0 sm:$0xff] }
   0x4   :  { %v34_v6 = vsel %vm33_vm0, %v272_v2, 0.0  ;;  %v40_v7 = vsel %vm33_vm0, %v276_v3, 0.0  ;;  %v37_v8 = vsel %vm33_vm0, %v273_v4, 0.0  ;;  %v43_v9 = vsel %vm33_vm0, %v277_v5, 0.0  ;;  %284 = vmatpush3.bf16.msra.mxu0 %v291_v30  ;;  %v256_v51 = vld [vmem:[%s387_s2] ss:$0 sm:$0xff] }
   0x5   :  { %35 = vadd.xlane.f32.xlu0 %v34_v6  ;;  %41 = vadd.xlane.f32.xlu1 %v40_v7 }
   0x6   :  { %285 = vmatprep.subr.bf16.mxu0 %v292_v31 }
   0x8   :  { %286 = vmatpush3.bf16.msra.mxu0 %v292_v31 }
   0x9   :  { %38 = vadd.xlane.f32.xlu0 %v37_v8  ;;  %44 = vadd.xlane.f32.xlu1 %v43_v9 }
  0x92   :  { %v36_v10 = vpop.xlane.xlu0 %35  ;;  %v42_v11 = vpop.xlane.xlu1 %41 }
  0x93   :  { %v47_v12 = vmul.f32 0.03125, %v36_v10  ;;  %v49_v13 = vmul.f32 0.03125, %v42_v11 }
  0x95   :  { %v51_v14 = vsub.f32 %v272_v2, %v47_v12  ;;  %v53_v15 = vsub.f32 %v276_v3, %v49_v13  ;;  %v257_v2 = vld [vmem:[%s388_s4] ss:$0 sm:$0xff] }
  0x96   :  { %v39_v16 = vpop.xlane.xlu0 %38  ;;  %v45_v17 = vpop.xlane.xlu1 %44 }
  0x97   :  { %v48_v18 = vmul.f32 0.03125, %v39_v16  ;;  %v50_v19 = vmul.f32 0.03125, %v45_v17  ;;  %v55_v20 = vmul.f32 %v51_v14, %v51_v14  ;;  %v57_v21 = vmul.f32 %v53_v15, %v53_v15 }
  0x99   :  { %v52_v22 = vsub.f32 %v273_v4, %v48_v18  ;;  %v54_v23 = vsub.f32 %v277_v5, %v50_v19  ;;  %v59_v24 = vsel %vm33_vm0, %v55_v20, 0.0  ;;  %v65_v25 = vsel %vm33_vm0, %v57_v21, 0.0 }
  0x9a   :  { %60 = vadd.xlane.f32.xlu0 %v59_v24 }
  0x9b   :  { %v56_v26 = vmul.f32 %v52_v22, %v52_v22  ;;  %v58_v27 = vmul.f32 %v54_v23, %v54_v23 }
  0x9d   :  { %v62_v28 = vsel %vm33_vm0, %v56_v26, 0.0  ;;  %v68_v29 = vsel %vm33_vm0, %v58_v27, 0.0 }
  0x9e   :  { %66 = vadd.xlane.f32.xlu0 %v65_v25  ;;  %63 = vadd.xlane.f32.xlu1 %v62_v28 }
  0xa2   :  { %69 = vadd.xlane.f32.xlu1 %v68_v29 }
 0x127   :  { %v61_v32 = vpop.xlane.xlu0 %60 }
 0x128   :  { %v71_v33 = vmul.f32 0.03125, %v61_v32 }
 0x12a   :  { %v75_v34 = vadd.f32 1e-06, %v71_v33 }
 0x12b   :  { %v64_v35 = vpop.xlane.xlu1 %63  ;;  %v67_v36 = vpop.xlane.xlu0 %66 }
 0x12c   :  { %293 = vrsqrt.f32 %v75_v34  ;;  %v72_v37 = vmul.f32 0.03125, %v64_v35  ;;  %v73_v38 = vmul.f32 0.03125, %v67_v36 }
 0x12e   :  { %v76_v39 = vadd.f32 1e-06, %v72_v37  ;;  %v77_v40 = vadd.f32 1e-06, %v73_v38 }
 0x12f   :  { %v70_v41 = vpop.xlane.xlu1 %69 }
 0x130   :  { %295 = vrsqrt.f32 %v76_v39  ;;  %v74_v42 = vmul.f32 0.03125, %v70_v41 }
 0x131   :  { %297 = vrsqrt.f32 %v77_v40 }
 0x132   :  { %v78_v43 = vadd.f32 1e-06, %v74_v42 }
 0x134   :  { %299 = vrsqrt.f32 %v78_v43 }
 0x136   :  { %v294_v44 = vpop.eup %293 }
 0x137   :  { %v83_v45 = vmul.f32 %v294_v44, %v51_v14 }
 0x139   :  { %v94_v49 = vmul.f32 %v255_v46, %v83_v45 }
 0x13a   :  { %v296_v47 = vpop.eup %295 }
 0x13b   :  { %v298_v48 = vpop.eup %297  ;;  %v84_v50 = vmul.f32 %v296_v47, %v52_v22  ;;  %v105_v55 = vadd.f32 %v256_v51, %v94_v49 }
 0x13c   :  { %v85_v52 = vmul.f32 %v298_v48, %v53_v15 }
 0x13d   :  { %v95_v53 = vmul.f32 %v255_v46, %v84_v50 }
 0x13e   :  { %v300_v54 = vpop.eup %299  ;;  %v96_v57 = vmul.f32 %v255_v46, %v85_v52 }
 0x13f   :  { %v106_v56 = vadd.f32 %v256_v51, %v95_v53  ;;  %v86_v58 = vmul.f32 %v300_v54, %v54_v23 }
 0x140   :  { %v107_v61 = vadd.f32 %v256_v51, %v96_v57 }
 0x141   :  { %v109_v59 = vpack.c.bf16 %v106_v56, %v105_v55  ;;  %v97_v60 = vmul.f32 %v255_v46, %v86_v58 }
 0x143   :  { %111 = vst.msk [vmem:[#allocation2] sm:$0xff] %vm33_vm0, %v109_v59  ;;  %v108_v62 = vadd.f32 %v256_v51, %v97_v60 }
 0x145   :  { %v110_v63 = vpack.c.bf16 %v108_v62, %v107_v61 }
 0x147   :  { %112 = vst.msk [vmem:[#allocation2 + $0x8] sm:$0xff] %vm33_vm0, %v110_v63 }
 0x14a   :  { %v113_v0 = vld [vmem:[#allocation2] sm:$0xff] }
 0x14b   :  { %287 = vmatprep.mubr.msk.bf16.mxu0 %vm33_vm0, %v113_v0 }
 0x14e   :  { %v114_v1 = vld [vmem:[#allocation2 + $0x8] sm:$0xff] }
 0x14f   :  { %288 = vmatmul.mubr.msk.bf16.vlgmr.msra.gmra.mrb[0].mxu0 %vm33_vm0, %v114_v1 }
 0x222   :  { %v289_v3 = vpop.f32.mrb[0].mxu0 }
 0x223   :  { %v188_v4 = vadd.f32 %v289_v3, %v257_v2  ;;  %v179_v5 = vpop.f32.mrb[1].mxu0 }
 0x224   :  { %v180_v6 = vadd.f32 %v257_v2, %v179_v5  ;;  %v290_v7 = vpop.f32.mrb[2].mxu0 }
 0x225   :  { %v200_v8 = vmul.f32 0.044715, %v188_v4  ;;  %v191_v9 = vadd.f32 %v290_v7, %v257_v2  ;;  %v182_v10 = vpop.f32.mrb[3].mxu0  ;;  %v196_v33 = vmul.f32 0.5, %v188_v4 }
 0x226   :  { %v198_v11 = vmul.f32 0.044715, %v180_v6  ;;  %v183_v12 = vadd.f32 %v257_v2, %v182_v10  ;;  %v194_v36 = vmul.f32 0.5, %v180_v6 }
 0x227   :  { %v204_v13 = vmul.f32 %v200_v8, %v188_v4  ;;  %v201_v14 = vmul.f32 0.044715, %v191_v9  ;;  %v197_v40 = vmul.f32 0.5, %v191_v9 }
 0x228   :  { %v202_v15 = vmul.f32 %v198_v11, %v180_v6  ;;  %v199_v16 = vmul.f32 0.044715, %v183_v12  ;;  %v195_v43 = vmul.f32 0.5, %v183_v12 }
 0x229   :  { %v208_v17 = vmul.f32 %v204_v13, %v188_v4  ;;  %v205_v18 = vmul.f32 %v201_v14, %v191_v9 }
 0x22a   :  { %v206_v19 = vmul.f32 %v202_v15, %v180_v6  ;;  %v203_v20 = vmul.f32 %v199_v16, %v183_v12 }
 0x22b   :  { %v212_v21 = vadd.f32 %v208_v17, %v188_v4  ;;  %v209_v22 = vmul.f32 %v205_v18, %v191_v9 }
 0x22c   :  { %v210_v23 = vadd.f32 %v206_v19, %v180_v6  ;;  %v207_v24 = vmul.f32 %v203_v20, %v183_v12 }
 0x22d   :  { %v216_v25 = vmul.f32 0.7978846, %v212_v21  ;;  %v213_v26 = vadd.f32 %v209_v22, %v191_v9 }
 0x22e   :  { %v214_v27 = vmul.f32 0.7978846, %v210_v23  ;;  %v211_v28 = vadd.f32 %v207_v24, %v183_v12 }
 0x22f   :  { %301 = vtanh.f32 %v216_v25  ;;  %v217_v29 = vmul.f32 0.7978846, %v213_v26 }
 0x230   :  { %303 = vtanh.f32 %v214_v27  ;;  %v215_v30 = vmul.f32 0.7978846, %v211_v28 }
 0x231   :  { %305 = vtanh.f32 %v217_v29 }
 0x232   :  { %307 = vtanh.f32 %v215_v30 }
 0x239   :  { %v302_v31 = vpop.eup %301 }
 0x23a   :  { %v304_v32 = vpop.eup %303  ;;  %v224_v34 = vadd.f32 1.0, %v302_v31 }
 0x23b   :  { %v306_v35 = vpop.eup %305  ;;  %v222_v37 = vadd.f32 1.0, %v304_v32 }
 0x23c   :  { %v308_v38 = vpop.eup %307  ;;  %v228_v39 = vmul.f32 %v224_v34, %v196_v33  ;;  %v225_v41 = vadd.f32 1.0, %v306_v35 }
 0x23d   :  { %v226_v42 = vmul.f32 %v222_v37, %v194_v36  ;;  %v223_v44 = vadd.f32 1.0, %v308_v38 }
 0x23e   :  { %v268_v45 = vpack.c.bf16 %v228_v39, %v228_v39  ;;  %v229_v46 = vmul.f32 %v225_v41, %v197_v40 }
 0x23f   :  { %v266_v47 = vpack.c.bf16 %v226_v42, %v226_v42  ;;  %v227_v48 = vmul.f32 %v223_v44, %v195_v43 }
 0x240   :  { %249 = vst.msk [vmem:[%s389_s5 + $0x8] sm:$0xf] %vm246_vm1, %v268_v45  ;;  %v269_v49 = vpack.c.bf16 %v229_v46, %v229_v46 }
 0x241   :  { %247 = vst.msk [vmem:[%s389_s5] sm:$0xf] %vm246_vm1, %v266_v47  ;;  %v267_v50 = vpack.c.bf16 %v227_v48, %v227_v48 }
 0x242   :  { %250 = vst.msk [vmem:[%s389_s5 + $0xc] sm:$0xf] %vm246_vm1, %v269_v49 }
 0x243   :  { %248 = vst.msk [vmem:[%s389_s5 + $0x4] sm:$0xf] %vm246_vm1, %v267_v50 }

</bundles_post_ra>
